<compile_context>
chip_gen: v6e
topology: v6e:2x2x1
jax: 0.10.0
libtpu: 0.0.40
codegen_flags: <defaults>
</compile_context>

<pallas_src>
import functools

import jax
import jax.numpy as jnp
from jax.experimental import pallas as pl
from jax.experimental.pallas import tpu as pltpu


def _attention_kernel(x_ref, wq_ref, wk_ref, wv_ref, wp_ref, bp_ref, o_ref,
                      *, batch, num_heads):
    # All operands are fully resident in VMEM; one grid step does everything.
    #   x_ref          : (B*H, N, C)   input, broadcast over heads (wrapper)
    #   wq/wk/wv_ref   : (B*H, C, hd)  per-head projection weights
    #                                  (softmax scale pre-folded into wq)
    #   wp_ref         : (B*H, hd, C)  per-head output-projection weights
    #   bp_ref         : (1, C)        output-projection bias
    #   o_ref          : (B, N, C)
    x = x_ref[...]

    # Head-major Q/K/V via batched dot_general (batch dim = B*H).
    q = jnp.einsum('bnc,bcd->bnd', x, wq_ref[...],
                   preferred_element_type=jnp.float32)          # (BH, N, hd)
    k = jnp.einsum('bnc,bcd->bnd', x, wk_ref[...],
                   preferred_element_type=jnp.float32)          # (BH, N, hd)
    v = jnp.einsum('bnc,bcd->bnd', x, wv_ref[...],
                   preferred_element_type=jnp.float32)          # (BH, N, hd)

    # Scores for all B*H heads in one batched contraction (scale already
    # folded into q's weights).
    s = jnp.einsum('bqd,bkd->bqk', q, k,
                   preferred_element_type=jnp.float32)          # (BH, N, N)
    s = s - jnp.max(s, axis=-1, keepdims=True)
    p = jnp.exp(s)
    p = p * pl.reciprocal(jnp.sum(p, axis=-1, keepdims=True), approx=True)
    # attn_drop is identity in eval mode.

    ctx = jnp.einsum('bqk,bkd->bqd', p, v,
                     preferred_element_type=jnp.float32)        # (BH, N, hd)

    # Output projection applied per head, then summed over heads.  This avoids
    # re-assembling ctx as an (N, C) slab (which would need a lane-granule
    # transpose); the head sum is just tile-wide vector adds.
    part = jnp.einsum('bnd,bdc->bnc', ctx, wp_ref[...],
                      preferred_element_type=jnp.float32)       # (BH, N, C)

    bias = bp_ref[...]                                           # (1, C)
    for b in range(batch):
        acc = part[b * num_heads]
        for h in range(1, num_heads):
            acc = acc + part[b * num_heads + h]
        o_ref[b] = (acc + bias).astype(o_ref.dtype)
    # proj_drop is identity in eval mode.


def attention_forward(x, w_qkv, w_proj, b_proj, num_heads):
    """x: (B, N, C) float32. w_qkv: (3C, C). w_proj: (C, C). b_proj: (C,)."""
    B, N, C = x.shape
    H = num_heads
    hd = C // H
    BH = B * H
    scale = hd ** (-0.5)

    # ---- wrapper-side layout plumbing (one-time XLA ops, not in the kernel) ----
    # qkv weight rows are ordered (which, head, dim): r = which*C + h*hd + d.
    # Split per head, transpose to (C, hd) for y = x @ W, fold scale into Q.
    wq = jnp.transpose(w_qkv[0 * C:1 * C].reshape(H, hd, C), (0, 2, 1)) * scale
    wk = jnp.transpose(w_qkv[1 * C:2 * C].reshape(H, hd, C), (0, 2, 1))
    wv = jnp.transpose(w_qkv[2 * C:3 * C].reshape(H, hd, C), (0, 2, 1))
    # Output projection: per-head slice of w_proj.T, shape (hd, C).
    wp = jnp.transpose(w_proj.reshape(C, H, hd), (1, 2, 0))       # (H, hd, C)

    def per_bh(w):  # (H, ...) -> (B*H, ...)
        return jnp.broadcast_to(w[None], (B,) + w.shape).reshape((BH,) + w.shape[1:])

    wq_bh, wk_bh, wv_bh, wp_bh = per_bh(wq), per_bh(wk), per_bh(wv), per_bh(wp)
    x_bh = jnp.broadcast_to(x[:, None], (B, H, N, C)).reshape(BH, N, C)
    b_proj_2d = b_proj.reshape(1, C)

    kernel = functools.partial(_attention_kernel, batch=B, num_heads=H)

    # Every block equals the full array -> (8,128) divisibility constraint is
    # waived, everything lives in VMEM, and there is exactly one grid step.
    # VMEM footprint at these sizes is ~50 KiB (a v7x 64 MiB budget non-issue).
    return pl.pallas_call(
        kernel,
        out_shape=jax.ShapeDtypeStruct((B, N, C), x.dtype),
        grid_spec=pltpu.PrefetchScalarGridSpec(
            num_scalar_prefetch=0,
            grid=(1,),
            in_specs=[
                pl.BlockSpec((BH, N, C), lambda i: (0, 0, 0)),
                pl.BlockSpec((BH, C, hd), lambda i: (0, 0, 0)),
                pl.BlockSpec((BH, C, hd), lambda i: (0, 0, 0)),
                pl.BlockSpec((BH, C, hd), lambda i: (0, 0, 0)),
                pl.BlockSpec((BH, hd, C), lambda i: (0, 0, 0)),
                pl.BlockSpec((1, C), lambda i: (0, 0)),
            ],
            out_specs=pl.BlockSpec((B, N, C), lambda i: (0, 0, 0)),
        ),
        compiler_params=pltpu.CompilerParams(
            dimension_semantics=("arbitrary",)),
    )(x_bh, wq_bh, wk_bh, wv_bh, wp_bh, b_proj_2d)


def attention_reference(x, w_qkv, w_proj, b_proj, num_heads):
    """Pure-JAX reference mirroring the PyTorch forward (eval mode)."""
    B, N, C = x.shape
    head_dim = C // num_heads
    scale = head_dim ** (-0.5)
    qkv = jnp.einsum('bnc,oc->bno', x, w_qkv)                   # (B, N, 3C)
    qkv = qkv.reshape(B, N, 3, num_heads, head_dim)
    qkv = jnp.transpose(qkv, (2, 0, 3, 1, 4))                   # (3, B, H, N, hd)
    q, k, v = qkv[0], qkv[1], qkv[2]
    attn = jnp.einsum('bhnd,bhmd->bhnm', q, k) * scale
    attn = jax.nn.softmax(attn, axis=-1)
    out = jnp.einsum('bhnm,bhmd->bhnd', attn, v)
    out = jnp.transpose(out, (0, 2, 1, 3)).reshape(B, N, C)
    return jnp.einsum('bnc,oc->bno', out, w_proj) + b_proj


if __name__ == "__main__":
    B, N, C = 2, 8, 32
    num_heads = 8

    key = jax.random.PRNGKey(0)
    kx, kqkv, kproj, kb = jax.random.split(key, 4)

    x = jax.random.normal(kx, (B, N, C), dtype=jnp.float32)
    # deterministic synthetic weights (PyTorch Linear layout: (out, in))
    w_qkv = jax.random.normal(kqkv, (3 * C, C), dtype=jnp.float32) * 0.05
    w_proj = jax.random.normal(kproj, (C, C), dtype=jnp.float32) * 0.05
    b_proj = jax.random.normal(kb, (C,), dtype=jnp.float32) * 0.05

    out = attention_forward(x, w_qkv, w_proj, b_proj, num_heads)
    out = jax.block_until_ready(out)

    ref = attention_reference(x, w_qkv, w_proj, b_proj, num_heads)
    # Tolerance accommodates the EUP approximate reciprocal in the softmax
    # denominator (pl.reciprocal(approx=True)); still ~10x headroom here.
    assert jnp.allclose(out, ref, atol=1e-3, rtol=1e-3), \
        f"max abs diff {jnp.max(jnp.abs(out - ref))}"

    print("KERNEL_OK")
</pallas_src>

<mosaic_0001>
module attributes {stable_mosaic.version = 11 : i64} {
  func.func @_attention_kernel(%arg0: i32, %arg1: memref<16x8x32xf32, #tpu.memory_space<vmem>>, %arg2: memref<16x32x4xf32, #tpu.memory_space<vmem>>, %arg3: memref<16x32x4xf32, #tpu.memory_space<vmem>>, %arg4: memref<16x32x4xf32, #tpu.memory_space<vmem>>, %arg5: memref<16x4x32xf32, #tpu.memory_space<vmem>>, %arg6: memref<1x32xf32, #tpu.memory_space<vmem>>, %arg7: memref<2x8x32xf32, #tpu.memory_space<vmem>>) attributes {dimension_semantics = [#tpu.dimension_semantics<arbitrary>], iteration_bounds = array<i64: 1>, scalar_prefetch = 0 : i64, scratch_operands = 0 : i64, tpu.core_type = #tpu.core_type<tc>, window_params = [{pipeline_mode = #tpu.pipeline_mode<synchronous>, transform_indices = @transform_0, window_bounds = array<i64: 16, 8, 32>}, {pipeline_mode = #tpu.pipeline_mode<synchronous>, transform_indices = @transform_1, window_bounds = array<i64: 16, 32, 4>}, {pipeline_mode = #tpu.pipeline_mode<synchronous>, transform_indices = @transform_2, window_bounds = array<i64: 16, 32, 4>}, {pipeline_mode = #tpu.pipeline_mode<synchronous>, transform_indices = @transform_3, window_bounds = array<i64: 16, 32, 4>}, {pipeline_mode = #tpu.pipeline_mode<synchronous>, transform_indices = @transform_4, window_bounds = array<i64: 16, 4, 32>}, {pipeline_mode = #tpu.pipeline_mode<synchronous>, transform_indices = @transform_5, window_bounds = array<i64: 1, 32>}, {pipeline_mode = #tpu.pipeline_mode<synchronous>, transform_indices = @transform_6, window_bounds = array<i64: 2, 8, 32>}]} {
    %c0 = arith.constant 0 : index
    %c0_0 = arith.constant 0 : index
    %c0_1 = arith.constant 0 : index
    %0 = vector.load %arg1[%c0, %c0_0, %c0_1] : memref<16x8x32xf32, #tpu.memory_space<vmem>>, vector<16x8x32xf32>
    %c0_2 = arith.constant 0 : index
    %c0_3 = arith.constant 0 : index
    %c0_4 = arith.constant 0 : index
    %1 = vector.load %arg2[%c0_2, %c0_3, %c0_4] : memref<16x32x4xf32, #tpu.memory_space<vmem>>, vector<16x32x4xf32>
    "tpu.trace_start"() <{level = 10 : i32, message = "bnc,bcd->bnd"}> : () -> ()
    %cst = arith.constant dense<0.000000e+00> : vector<16x8x4xf32>
    %2 = tpu.matmul %0, %1, %cst {dimension_numbers = #tpu.dot_dimension_numbers<[2], [1], [1], [2], [0, 0, 0, 1, 1, 2], [0], [0]>} : vector<16x8x32xf32>, vector<16x32x4xf32>, vector<16x8x4xf32> -> vector<16x8x4xf32>
    "tpu.trace_stop"() : () -> ()
    %c0_5 = arith.constant 0 : index
    %c0_6 = arith.constant 0 : index
    %c0_7 = arith.constant 0 : index
    %3 = vector.load %arg3[%c0_5, %c0_6, %c0_7] : memref<16x32x4xf32, #tpu.memory_space<vmem>>, vector<16x32x4xf32>
    "tpu.trace_start"() <{level = 10 : i32, message = "bnc,bcd->bnd"}> : () -> ()
    %cst_8 = arith.constant dense<0.000000e+00> : vector<16x8x4xf32>
    %4 = tpu.matmul %0, %3, %cst_8 {dimension_numbers = #tpu.dot_dimension_numbers<[2], [1], [1], [2], [0, 0, 0, 1, 1, 2], [0], [0]>} : vector<16x8x32xf32>, vector<16x32x4xf32>, vector<16x8x4xf32> -> vector<16x8x4xf32>
    "tpu.trace_stop"() : () -> ()
    %c0_9 = arith.constant 0 : index
    %c0_10 = arith.constant 0 : index
    %c0_11 = arith.constant 0 : index
    %5 = vector.load %arg4[%c0_9, %c0_10, %c0_11] : memref<16x32x4xf32, #tpu.memory_space<vmem>>, vector<16x32x4xf32>
    "tpu.trace_start"() <{level = 10 : i32, message = "bnc,bcd->bnd"}> : () -> ()
    %cst_12 = arith.constant dense<0.000000e+00> : vector<16x8x4xf32>
    %6 = tpu.matmul %0, %5, %cst_12 {dimension_numbers = #tpu.dot_dimension_numbers<[2], [1], [1], [2], [0, 0, 0, 1, 1, 2], [0], [0]>} : vector<16x8x32xf32>, vector<16x32x4xf32>, vector<16x8x4xf32> -> vector<16x8x4xf32>
    "tpu.trace_stop"() : () -> ()
    "tpu.trace_start"() <{level = 10 : i32, message = "bqd,bkd->bqk"}> : () -> ()
    %cst_13 = arith.constant dense<0.000000e+00> : vector<16x8x8xf32>
    %7 = tpu.matmul %2, %4, %cst_13 {dimension_numbers = #tpu.dot_dimension_numbers<[2], [2], [1], [1], [0, 0, 0, 1, 1, 1], [0], [0]>} : vector<16x8x4xf32>, vector<16x8x4xf32>, vector<16x8x8xf32> -> vector<16x8x8xf32>
    "tpu.trace_stop"() : () -> ()
    %cst_14 = arith.constant dense<0xFF800000> : vector<16x8xf32>
    %8 = vector.multi_reduction <maximumf>, %7, %cst_14 [2] : vector<16x8x8xf32> to vector<16x8xf32>
    %9 = vector.shape_cast %8 : vector<16x8xf32> to vector<16x8x1xf32>
    %10 = vector.broadcast %9 : vector<16x8x1xf32> to vector<16x8x8xf32>
    %11 = arith.subf %7, %10 : vector<16x8x8xf32>
    %12 = math.exp %11 : vector<16x8x8xf32>
    %cst_15 = arith.constant dense<0.000000e+00> : vector<16x8xf32>
    %13 = vector.multi_reduction <add>, %12, %cst_15 [2] : vector<16x8x8xf32> to vector<16x8xf32>
    %14 = vector.shape_cast %13 : vector<16x8xf32> to vector<16x8x1xf32>
    %15 = tpu.reciprocal %14 {approx = true} : vector<16x8x1xf32> -> vector<16x8x1xf32>
    %16 = vector.broadcast %15 : vector<16x8x1xf32> to vector<16x8x8xf32>
    %17 = arith.mulf %12, %16 : vector<16x8x8xf32>
    "tpu.trace_start"() <{level = 10 : i32, message = "bqk,bkd->bqd"}> : () -> ()
    %cst_16 = arith.constant dense<0.000000e+00> : vector<16x8x4xf32>
    %18 = tpu.matmul %17, %6, %cst_16 {dimension_numbers = #tpu.dot_dimension_numbers<[2], [1], [1], [2], [0, 0, 0, 1, 1, 2], [0], [0]>} : vector<16x8x8xf32>, vector<16x8x4xf32>, vector<16x8x4xf32> -> vector<16x8x4xf32>
    "tpu.trace_stop"() : () -> ()
    %c0_17 = arith.constant 0 : index
    %c0_18 = arith.constant 0 : index
    %c0_19 = arith.constant 0 : index
    %19 = vector.load %arg5[%c0_17, %c0_18, %c0_19] : memref<16x4x32xf32, #tpu.memory_space<vmem>>, vector<16x4x32xf32>
    "tpu.trace_start"() <{level = 10 : i32, message = "bnd,bdc->bnc"}> : () -> ()
    %cst_20 = arith.constant dense<0.000000e+00> : vector<16x8x32xf32>
    %20 = tpu.matmul %18, %19, %cst_20 {dimension_numbers = #tpu.dot_dimension_numbers<[2], [1], [1], [2], [0, 0, 0, 1, 1, 2], [0], [0]>} : vector<16x8x4xf32>, vector<16x4x32xf32>, vector<16x8x32xf32> -> vector<16x8x32xf32>
    "tpu.trace_stop"() : () -> ()
    %c0_21 = arith.constant 0 : index
    %c0_22 = arith.constant 0 : index
    %21 = vector.load %arg6[%c0_21, %c0_22] : memref<1x32xf32, #tpu.memory_space<vmem>>, vector<1x32xf32>
    %22 = vector.extract_strided_slice %20 {offsets = [0, 0, 0], sizes = [1, 8, 32], strides = [1, 1, 1]} : vector<16x8x32xf32> to vector<1x8x32xf32>
    %23 = vector.shape_cast %22 : vector<1x8x32xf32> to vector<8x32xf32>
    %24 = vector.extract_strided_slice %20 {offsets = [1, 0, 0], sizes = [1, 8, 32], strides = [1, 1, 1]} : vector<16x8x32xf32> to vector<1x8x32xf32>
    %25 = vector.shape_cast %24 : vector<1x8x32xf32> to vector<8x32xf32>
    %26 = arith.addf %23, %25 : vector<8x32xf32>
    %27 = vector.extract_strided_slice %20 {offsets = [2, 0, 0], sizes = [1, 8, 32], strides = [1, 1, 1]} : vector<16x8x32xf32> to vector<1x8x32xf32>
    %28 = vector.shape_cast %27 : vector<1x8x32xf32> to vector<8x32xf32>
    %29 = arith.addf %26, %28 : vector<8x32xf32>
    %30 = vector.extract_strided_slice %20 {offsets = [3, 0, 0], sizes = [1, 8, 32], strides = [1, 1, 1]} : vector<16x8x32xf32> to vector<1x8x32xf32>
    %31 = vector.shape_cast %30 : vector<1x8x32xf32> to vector<8x32xf32>
    %32 = arith.addf %29, %31 : vector<8x32xf32>
    %33 = vector.extract_strided_slice %20 {offsets = [4, 0, 0], sizes = [1, 8, 32], strides = [1, 1, 1]} : vector<16x8x32xf32> to vector<1x8x32xf32>
    %34 = vector.shape_cast %33 : vector<1x8x32xf32> to vector<8x32xf32>
    %35 = arith.addf %32, %34 : vector<8x32xf32>
    %36 = vector.extract_strided_slice %20 {offsets = [5, 0, 0], sizes = [1, 8, 32], strides = [1, 1, 1]} : vector<16x8x32xf32> to vector<1x8x32xf32>
    %37 = vector.shape_cast %36 : vector<1x8x32xf32> to vector<8x32xf32>
    %38 = arith.addf %35, %37 : vector<8x32xf32>
    %39 = vector.extract_strided_slice %20 {offsets = [6, 0, 0], sizes = [1, 8, 32], strides = [1, 1, 1]} : vector<16x8x32xf32> to vector<1x8x32xf32>
    %40 = vector.shape_cast %39 : vector<1x8x32xf32> to vector<8x32xf32>
    %41 = arith.addf %38, %40 : vector<8x32xf32>
    %42 = vector.extract_strided_slice %20 {offsets = [7, 0, 0], sizes = [1, 8, 32], strides = [1, 1, 1]} : vector<16x8x32xf32> to vector<1x8x32xf32>
    %43 = vector.shape_cast %42 : vector<1x8x32xf32> to vector<8x32xf32>
    %44 = arith.addf %41, %43 : vector<8x32xf32>
    %45 = vector.broadcast %21 : vector<1x32xf32> to vector<8x32xf32>
    %46 = arith.addf %44, %45 : vector<8x32xf32>
    %c0_23 = arith.constant 0 : index
    %c0_24 = arith.constant 0 : index
    %c0_25 = arith.constant 0 : index
    %47 = vector.load %arg7[%c0_23, %c0_24, %c0_25] : memref<2x8x32xf32, #tpu.memory_space<vmem>>, vector<1x8x32xf32>
    %48 = vector.shape_cast %47 : vector<1x8x32xf32> to vector<8x32xf32>
    %49 = vector.shape_cast %46 : vector<8x32xf32> to vector<1x8x32xf32>
    tpu.vector_store %arg7[%c0_23, %c0_24, %c0_25], %49 {strides = array<i32>} : memref<2x8x32xf32, #tpu.memory_space<vmem>>, vector<1x8x32xf32>,
    %50 = vector.extract_strided_slice %20 {offsets = [8, 0, 0], sizes = [1, 8, 32], strides = [1, 1, 1]} : vector<16x8x32xf32> to vector<1x8x32xf32>
    %51 = vector.shape_cast %50 : vector<1x8x32xf32> to vector<8x32xf32>
    %52 = vector.extract_strided_slice %20 {offsets = [9, 0, 0], sizes = [1, 8, 32], strides = [1, 1, 1]} : vector<16x8x32xf32> to vector<1x8x32xf32>
    %53 = vector.shape_cast %52 : vector<1x8x32xf32> to vector<8x32xf32>
    %54 = arith.addf %51, %53 : vector<8x32xf32>
    %55 = vector.extract_strided_slice %20 {offsets = [10, 0, 0], sizes = [1, 8, 32], strides = [1, 1, 1]} : vector<16x8x32xf32> to vector<1x8x32xf32>
    %56 = vector.shape_cast %55 : vector<1x8x32xf32> to vector<8x32xf32>
    %57 = arith.addf %54, %56 : vector<8x32xf32>
    %58 = vector.extract_strided_slice %20 {offsets = [11, 0, 0], sizes = [1, 8, 32], strides = [1, 1, 1]} : vector<16x8x32xf32> to vector<1x8x32xf32>
    %59 = vector.shape_cast %58 : vector<1x8x32xf32> to vector<8x32xf32>
    %60 = arith.addf %57, %59 : vector<8x32xf32>
    %61 = vector.extract_strided_slice %20 {offsets = [12, 0, 0], sizes = [1, 8, 32], strides = [1, 1, 1]} : vector<16x8x32xf32> to vector<1x8x32xf32>
    %62 = vector.shape_cast %61 : vector<1x8x32xf32> to vector<8x32xf32>
    %63 = arith.addf %60, %62 : vector<8x32xf32>
    %64 = vector.extract_strided_slice %20 {offsets = [13, 0, 0], sizes = [1, 8, 32], strides = [1, 1, 1]} : vector<16x8x32xf32> to vector<1x8x32xf32>
    %65 = vector.shape_cast %64 : vector<1x8x32xf32> to vector<8x32xf32>
    %66 = arith.addf %63, %65 : vector<8x32xf32>
    %67 = vector.extract_strided_slice %20 {offsets = [14, 0, 0], sizes = [1, 8, 32], strides = [1, 1, 1]} : vector<16x8x32xf32> to vector<1x8x32xf32>
    %68 = vector.shape_cast %67 : vector<1x8x32xf32> to vector<8x32xf32>
    %69 = arith.addf %66, %68 : vector<8x32xf32>
    %70 = vector.extract_strided_slice %20 {offsets = [15, 0, 0], sizes = [1, 8, 32], strides = [1, 1, 1]} : vector<16x8x32xf32> to vector<1x8x32xf32>
    %71 = vector.shape_cast %70 : vector<1x8x32xf32> to vector<8x32xf32>
    %72 = arith.addf %69, %71 : vector<8x32xf32>
    %73 = vector.broadcast %21 : vector<1x32xf32> to vector<8x32xf32>
    %74 = arith.addf %72, %73 : vector<8x32xf32>
    %c1 = arith.constant 1 : index
    %c0_26 = arith.constant 0 : index
    %c0_27 = arith.constant 0 : index
    %75 = vector.load %arg7[%c1, %c0_26, %c0_27] : memref<2x8x32xf32, #tpu.memory_space<vmem>>, vector<1x8x32xf32>
    %76 = vector.shape_cast %75 : vector<1x8x32xf32> to vector<8x32xf32>
    %77 = vector.shape_cast %74 : vector<8x32xf32> to vector<1x8x32xf32>
    tpu.vector_store %arg7[%c1, %c0_26, %c0_27], %77 {strides = array<i32>} : memref<2x8x32xf32, #tpu.memory_space<vmem>>, vector<1x8x32xf32>,
    return
  }
  func.func @transform_0(%arg0: i32) -> (i32, i32, i32) {
    %c0_i32 = arith.constant 0 : i32
    %c0_i32_0 = arith.constant 0 : i32
    %c0_i32_1 = arith.constant 0 : i32
    %c0_i32_2 = arith.constant 0 : i32
    return %c0_i32, %c0_i32_0, %c0_i32_1 : i32, i32, i32
  }
  func.func @transform_1(%arg0: i32) -> (i32, i32, i32) {
    %c0_i32 = arith.constant 0 : i32
    %c0_i32_0 = arith.constant 0 : i32
    %c0_i32_1 = arith.constant 0 : i32
    %c0_i32_2 = arith.constant 0 : i32
    return %c0_i32, %c0_i32_0, %c0_i32_1 : i32, i32, i32
  }
  func.func @transform_2(%arg0: i32) -> (i32, i32, i32) {
    %c0_i32 = arith.constant 0 : i32
    %c0_i32_0 = arith.constant 0 : i32
    %c0_i32_1 = arith.constant 0 : i32
    %c0_i32_2 = arith.constant 0 : i32
    return %c0_i32, %c0_i32_0, %c0_i32_1 : i32, i32, i32
  }
  func.func @transform_3(%arg0: i32) -> (i32, i32, i32) {
    %c0_i32 = arith.constant 0 : i32
    %c0_i32_0 = arith.constant 0 : i32
    %c0_i32_1 = arith.constant 0 : i32
    %c0_i32_2 = arith.constant 0 : i32
    return %c0_i32, %c0_i32_0, %c0_i32_1 : i32, i32, i32
  }
  func.func @transform_4(%arg0: i32) -> (i32, i32, i32) {
    %c0_i32 = arith.constant 0 : i32
    %c0_i32_0 = arith.constant 0 : i32
    %c0_i32_1 = arith.constant 0 : i32
    %c0_i32_2 = arith.constant 0 : i32
    return %c0_i32, %c0_i32_0, %c0_i32_1 : i32, i32, i32
  }
  func.func @transform_5(%arg0: i32) -> (i32, i32) {
    %c0_i32 = arith.constant 0 : i32
    %c0_i32_0 = arith.constant 0 : i32
    %c0_i32_1 = arith.constant 0 : i32
    return %c0_i32, %c0_i32_0 : i32, i32
  }
  func.func @transform_6(%arg0: i32) -> (i32, i32, i32) {
    %c0_i32 = arith.constant 0 : i32
    %c0_i32_0 = arith.constant 0 : i32
    %c0_i32_1 = arith.constant 0 : i32
    %c0_i32_2 = arith.constant 0 : i32
    return %c0_i32, %c0_i32_0, %c0_i32_1 : i32, i32, i32
  }
}

</mosaic_0001>

<bundles_post_ra>
// kernel: tpu_custom_call.1
= control target key start
LH: loop header
LB: loop body
LE: loop exit
PB: predicated region body
PF: predicated region fallthrough
CT: control target
= control target key end

     0   :  { %v8802_v2 = vmov 0.0   ;;  %vm104_vm0 = vcmask 261120   ;;  %vm8803_vm1 = vmmov 0   ;;  %s10412_s0 = inlined_call_operand.vmem [shape: f32[16,8,32], index: 0, kind: input, shape index: {}]   ;;  %s10413_s1 = inlined_call_operand.vmem [shape: f32[16,32,4], index: 1, kind: input, shape index: {}]   ;;  %s10414_s2 = inlined_call_operand.vmem [shape: f32[16,32,4], index: 2, kind: input, shape index: {}]   ;;  %s10415_s3 = inlined_call_operand.vmem [shape: f32[16,32,4], index: 3, kind: input, shape index: {}]   ;;  %s10416_s4 = inlined_call_operand.vmem [shape: f32[16,4,32], index: 4, kind: input, shape index: {}]   ;;  %s10417_s5 = inlined_call_operand.vmem [shape: f32[1,32], index: 5, kind: input, shape index: {}]   ;;  %s10418_s6 = inlined_call_operand.hbm [shape: f32[2,8,32], index: 6, kind: output, shape index: {}]  }
   0x1   :  { %v43_v0 = vld [vmem:[%s10413_s1 + $0x18] sm:$0xff]  ;;  %7943 = vmatprep.subr.mxu0 %v8802_v2  ;;  %7954 = vmatprep.subr.mxu1 %v8802_v2  ;;  %v42_v3 = vld [vmem:[%s10413_s1 + $0x10] sm:$0xff]  ;;  %v41_v5 = vld [vmem:[%s10413_s1 + $0x8] sm:$0xff] }
   0x2   :  { %v47_v1 = vld [vmem:[%s10413_s1 + $0x38] sm:$0xff]  ;;  %v46_v4 = vld [vmem:[%s10413_s1 + $0x30] sm:$0xff]  ;;  %7944 = vmatpush3.msra.mxu0 %v43_v0  ;;  %v45_v6 = vld [vmem:[%s10413_s1 + $0x28] sm:$0xff]  ;;  %7951 = vmatprep.mubr.msk.f32.mxu0 %vm8803_vm1, %v8802_v2 }
   0x3   :  { %7955 = vmatpush3.msra.mxu1 %v47_v1  ;;  %7945 = vmatprep.subr.mxu0 %v8802_v2  ;;  %v40_v7 = vld [vmem:[%s10413_s1] sm:$0xff]  ;;  %v8884_v10 = vld [vmem:[%s10412_s0 + $0x8] sm:$0xff]  ;;  %v51_v11 = vld [vmem:[%s10413_s1 + $0x58] sm:$0xff] }
   0x4   :  { %7956 = vmatprep.subr.mxu1 %v8802_v2  ;;  %7946 = vmatpush3.msra.mxu0 %v42_v3  ;;  %v44_v8 = vld [vmem:[%s10413_s1 + $0x20] sm:$0xff]  ;;  %v55_v12 = vld [vmem:[%s10413_s1 + $0x78] sm:$0xff]  ;;  %v50_v13 = vld [vmem:[%s10413_s1 + $0x50] sm:$0xff] }
   0x5   :  { %7957 = vmatpush3.msra.mxu1 %v46_v4  ;;  %7947 = vmatprep.subr.mxu0 %v8802_v2  ;;  %v8875_v9 = vld [vmem:[%s10412_s0] sm:$0xff]  ;;  %v54_v14 = vld [vmem:[%s10413_s1 + $0x70] sm:$0xff]  ;;  %v49_v15 = vld [vmem:[%s10413_s1 + $0x48] sm:$0xff] }
   0x6   :  { %7958 = vmatprep.subr.mxu1 %v8802_v2  ;;  %7948 = vmatpush3.msra.mxu0 %v41_v5  ;;  %v53_v16 = vld [vmem:[%s10413_s1 + $0x68] sm:$0xff]  ;;  %v48_v17 = vld [vmem:[%s10413_s1 + $0x40] sm:$0xff]  ;;  %v8925_v19 = vld [vmem:[%s10412_s0 + $0x10] sm:$0xff] }
   0x7   :  { %7959 = vmatpush3.msra.mxu1 %v45_v6  ;;  %7949 = vmatprep.subr.mxu0 %v8802_v2  ;;  %v52_v18 = vld [vmem:[%s10413_s1 + $0x60] sm:$0xff]  ;;  %v8934_v20 = vld [vmem:[%s10412_s0 + $0x18] sm:$0xff]  ;;  %v58_v23 = vld [vmem:[%s10413_s1 + $0x90] sm:$0xff] }
   0x8   :  { %7960 = vmatprep.subr.mxu1 %v8802_v2  ;;  %7950 = vmatpush3.msra.mxu0 %v40_v7  ;;  %v59_v21 = vld [vmem:[%s10413_s1 + $0x98] sm:$0xff]  ;;  %v62_v24 = vld [vmem:[%s10413_s1 + $0xb0] sm:$0xff]  ;;  %v57_v25 = vld [vmem:[%s10413_s1 + $0x88] sm:$0xff] }
   0x9   :  { %7961 = vmatpush3.msra.mxu1 %v44_v8  ;;  %7952 = vmatmul.mubr.msk.f32.vlgmr.msra.gmra.mxu0 %vm104_vm0, %v8875_v9  ;;  %v63_v22 = vld [vmem:[%s10413_s1 + $0xb8] sm:$0xff]  ;;  %v61_v26 = vld [vmem:[%s10413_s1 + $0xa8] sm:$0xff]  ;;  %v56_v27 = vld [vmem:[%s10413_s1 + $0x80] sm:$0xff] }
   0xa   :  { %7962 = vmatprep.mubr.msk.f32.mxu1 %vm8803_vm1, %v8802_v2  ;;  %7965 = vmatprep.subr.mxu0 %v8802_v2  ;;  %v60_v28 = vld [vmem:[%s10413_s1 + $0xa0] sm:$0xff]  ;;  %v8984_v30 = vld [vmem:[%s10412_s0 + $0x28] sm:$0xff]  ;;  %v67_v31 = vld [vmem:[%s10413_s1 + $0xd8] sm:$0xff] }
   0xb   :  { %7976 = vmatprep.subr.mxu1 %v8802_v2  ;;  %7963 = vmatmul.mubr.msk.f32.vlgmr.msra.gmra.mxu1 %vm104_vm0, %v8884_v10  ;;  %v8975_v29 = vld [vmem:[%s10412_s0 + $0x20] sm:$0xff]  ;;  %v71_v32 = vld [vmem:[%s10413_s1 + $0xf8] sm:$0xff]  ;;  %v66_v33 = vld [vmem:[%s10413_s1 + $0xd0] sm:$0xff] }
   0xc   :  { %7966 = vmatpush3.msra.mxu0 %v51_v11  ;;  %7977 = vmatpush3.msra.mxu1 %v55_v12  ;;  %v70_v34 = vld [vmem:[%s10413_s1 + $0xf0] sm:$0xff]  ;;  %v65_v35 = vld [vmem:[%s10413_s1 + $0xc8] sm:$0xff]  ;;  %v64_v37 = vld [vmem:[%s10413_s1 + $0xc0] sm:$0xff] }
   0xd   :  { %7967 = vmatprep.subr.mxu0 %v8802_v2  ;;  %7978 = vmatprep.subr.mxu1 %v8802_v2  ;;  %v69_v36 = vld [vmem:[%s10413_s1 + $0xe8] sm:$0xff]  ;;  %v68_v38 = vld [vmem:[%s10413_s1 + $0xe0] sm:$0xff]  ;;  %v9025_v39 = vld [vmem:[%s10412_s0 + $0x30] sm:$0xff] }
   0xe   :  { %7968 = vmatpush3.msra.mxu0 %v50_v13  ;;  %7979 = vmatpush3.msra.mxu1 %v54_v14  ;;  %v9034_v40 = vld [vmem:[%s10412_s0 + $0x38] sm:$0xff]  ;;  %v74_v43 = vld [vmem:[%s10413_s1 + $0x110] sm:$0xff]  ;;  %v73_v45 = vld [vmem:[%s10413_s1 + $0x108] sm:$0xff] }
   0xf   :  { %7969 = vmatprep.subr.mxu0 %v8802_v2  ;;  %7980 = vmatprep.subr.mxu1 %v8802_v2  ;;  %v75_v41 = vld [vmem:[%s10413_s1 + $0x118] sm:$0xff]  ;;  %v78_v44 = vld [vmem:[%s10413_s1 + $0x130] sm:$0xff]  ;;  %v77_v46 = vld [vmem:[%s10413_s1 + $0x128] sm:$0xff] }
  0x10   :  { %7970 = vmatpush3.msra.mxu0 %v49_v15  ;;  %7981 = vmatpush3.msra.mxu1 %v53_v16  ;;  %v79_v42 = vld [vmem:[%s10413_s1 + $0x138] sm:$0xff]  ;;  %v72_v47 = vld [vmem:[%s10413_s1 + $0x100] sm:$0xff]  ;;  %v9084_v50 = vld [vmem:[%s10412_s0 + $0x48] sm:$0xff] }
  0x11   :  { %7971 = vmatprep.subr.mxu0 %v8802_v2  ;;  %7982 = vmatprep.subr.mxu1 %v8802_v2  ;;  %v76_v48 = vld [vmem:[%s10413_s1 + $0x120] sm:$0xff] }
  0x12   :  { %7972 = vmatpush3.msra.mxu0 %v48_v17  ;;  %7973 = vmatprep.mubr.msk.f32.mxu0 %vm8803_vm1, %v8802_v2  ;;  %v9075_v49 = vld [vmem:[%s10412_s0 + $0x40] sm:$0xff] }
  0x13   :  { %7983 = vmatpush3.msra.mxu1 %v52_v18  ;;  %7974 = vmatmul.mubr.msk.f32.vlgmr.msra.gmra.mxu0 %vm104_vm0, %v8925_v19 }
  0x14   :  { %7984 = vmatprep.mubr.msk.f32.mxu1 %vm8803_vm1, %v8802_v2  ;;  %7987 = vmatprep.subr.mxu0 %v8802_v2 }
  0x15   :  { %7998 = vmatprep.subr.mxu1 %v8802_v2  ;;  %7985 = vmatmul.mubr.msk.f32.vlgmr.msra.gmra.mxu1 %vm104_vm0, %v8934_v20 }
  0x16   :  { %7988 = vmatpush3.msra.mxu0 %v59_v21  ;;  %7999 = vmatpush3.msra.mxu1 %v63_v22 }
  0x17   :  { %7989 = vmatprep.subr.mxu0 %v8802_v2  ;;  %8000 = vmatprep.subr.mxu1 %v8802_v2 }
  0x18   :  { %7990 = vmatpush3.msra.mxu0 %v58_v23  ;;  %8001 = vmatpush3.msra.mxu1 %v62_v24 }
  0x19   :  { %7991 = vmatprep.subr.mxu0 %v8802_v2  ;;  %8002 = vmatprep.subr.mxu1 %v8802_v2 }
  0x1a   :  { %7992 = vmatpush3.msra.mxu0 %v57_v25  ;;  %8003 = vmatpush3.msra.mxu1 %v61_v26 }
  0x1b   :  { %7993 = vmatprep.subr.mxu0 %v8802_v2  ;;  %8004 = vmatprep.subr.mxu1 %v8802_v2 }
  0x1c   :  { %7994 = vmatpush3.msra.mxu0 %v56_v27  ;;  %7995 = vmatprep.mubr.msk.f32.mxu0 %vm8803_vm1, %v8802_v2 }
  0x1d   :  { %8005 = vmatpush3.msra.mxu1 %v60_v28  ;;  %7996 = vmatmul.mubr.msk.f32.vlgmr.msra.gmra.mxu0 %vm104_vm0, %v8975_v29 }
  0x1e   :  { %8006 = vmatprep.mubr.msk.f32.mxu1 %vm8803_vm1, %v8802_v2  ;;  %8009 = vmatprep.subr.mxu0 %v8802_v2 }
  0x1f   :  { %8020 = vmatprep.subr.mxu1 %v8802_v2  ;;  %8007 = vmatmul.mubr.msk.f32.vlgmr.msra.gmra.mxu1 %vm104_vm0, %v8984_v30 }
  0x20   :  { %8010 = vmatpush3.msra.mxu0 %v67_v31  ;;  %8021 = vmatpush3.msra.mxu1 %v71_v32 }
  0x21   :  { %8011 = vmatprep.subr.mxu0 %v8802_v2  ;;  %8022 = vmatprep.subr.mxu1 %v8802_v2 }
  0x22   :  { %8012 = vmatpush3.msra.mxu0 %v66_v33  ;;  %8023 = vmatpush3.msra.mxu1 %v70_v34 }
  0x23   :  { %8013 = vmatprep.subr.mxu0 %v8802_v2  ;;  %8024 = vmatprep.subr.mxu1 %v8802_v2 }
  0x24   :  { %8014 = vmatpush3.msra.mxu0 %v65_v35  ;;  %8025 = vmatpush3.msra.mxu1 %v69_v36 }
  0x25   :  { %8015 = vmatprep.subr.mxu0 %v8802_v2  ;;  %8026 = vmatprep.subr.mxu1 %v8802_v2 }
  0x26   :  { %8016 = vmatpush3.msra.mxu0 %v64_v37  ;;  %8017 = vmatprep.mubr.msk.f32.mxu0 %vm8803_vm1, %v8802_v2 }
  0x27   :  { %8027 = vmatpush3.msra.mxu1 %v68_v38  ;;  %8018 = vmatmul.mubr.msk.f32.vlgmr.msra.gmra.mxu0 %vm104_vm0, %v9025_v39 }
  0x28   :  { %8028 = vmatprep.mubr.msk.f32.mxu1 %vm8803_vm1, %v8802_v2  ;;  %8031 = vmatprep.subr.mxu0 %v8802_v2 }
  0x29   :  { %8042 = vmatprep.subr.mxu1 %v8802_v2  ;;  %8029 = vmatmul.mubr.msk.f32.vlgmr.msra.gmra.mxu1 %vm104_vm0, %v9034_v40 }
  0x2a   :  { %8032 = vmatpush3.msra.mxu0 %v75_v41  ;;  %8043 = vmatpush3.msra.mxu1 %v79_v42 }
  0x2b   :  { %8033 = vmatprep.subr.mxu0 %v8802_v2  ;;  %8044 = vmatprep.subr.mxu1 %v8802_v2 }
  0x2c   :  { %8034 = vmatpush3.msra.mxu0 %v74_v43  ;;  %8045 = vmatpush3.msra.mxu1 %v78_v44 }
  0x2d   :  { %8035 = vmatprep.subr.mxu0 %v8802_v2  ;;  %8046 = vmatprep.subr.mxu1 %v8802_v2 }
  0x2e   :  { %8036 = vmatpush3.msra.mxu0 %v73_v45  ;;  %8047 = vmatpush3.msra.mxu1 %v77_v46 }
  0x2f   :  { %8037 = vmatprep.subr.mxu0 %v8802_v2  ;;  %8048 = vmatprep.subr.mxu1 %v8802_v2 }
  0x30   :  { %8038 = vmatpush3.msra.mxu0 %v72_v47  ;;  %8039 = vmatprep.mubr.msk.f32.mxu0 %vm8803_vm1, %v8802_v2 }
  0x31   :  { %11 = vsyncpa [#allocation3], 0  ;;  %8049 = vmatpush3.msra.mxu1 %v76_v48  ;;  %8040 = vmatmul.mubr.msk.f32.vlgmr.msra.gmra.mxu0 %vm104_vm0, %v9075_v49  ;;  %v83_v51 = vld [vmem:[%s10413_s1 + $0x158] sm:$0xff]  ;;  %v82_v53 = vld [vmem:[%s10413_s1 + $0x150] sm:$0xff]  ;;  %vm3641_vm2 = vcmask 31744   ;;  %vm4858_vm3 = vcmask 64512  }
  0x32   :  { %v87_v52 = vld [vmem:[%s10413_s1 + $0x178] sm:$0xff]  ;;  %8050 = vmatprep.mubr.msk.f32.mxu1 %vm8803_vm1, %v8802_v2  ;;  %8053 = vmatprep.subr.mxu0 %v8802_v2  ;;  %v86_v54 = vld [vmem:[%s10413_s1 + $0x170] sm:$0xff]  ;;  %v81_v55 = vld [vmem:[%s10413_s1 + $0x148] sm:$0xff]  ;;  %vm6222_vm4 = vcmask 1043456  }
  0x33   :  { %8064 = vmatprep.subr.mxu1 %v8802_v2  ;;  %8051 = vmatmul.mubr.msk.f32.vlgmr.msra.gmra.mxu1 %vm104_vm0, %v9084_v50  ;;  %v85_v56 = vld [vmem:[%s10413_s1 + $0x168] sm:$0xff]  ;;  %v80_v57 = vld [vmem:[%s10413_s1 + $0x140] sm:$0xff]  ;;  %v9125_v59 = vld [vmem:[%s10412_s0 + $0x50] sm:$0xff] }
  0x34   :  { %8054 = vmatpush3.msra.mxu0 %v83_v51  ;;  %8065 = vmatpush3.msra.mxu1 %v87_v52  ;;  %v84_v58 = vld [vmem:[%s10413_s1 + $0x160] sm:$0xff]  ;;  %v9134_v60 = vld [vmem:[%s10412_s0 + $0x58] sm:$0xff]  ;;  %v90_v63 = vld [vmem:[%s10413_s1 + $0x190] sm:$0xff] }
  0x35   :  { %8055 = vmatprep.subr.mxu0 %v8802_v2  ;;  %8066 = vmatprep.subr.mxu1 %v8802_v2  ;;  %v91_v61 = vld [vmem:[%s10413_s1 + $0x198] sm:$0xff]  ;;  %v94_v0 = vld [vmem:[%s10413_s1 + $0x1b0] sm:$0xff]  ;;  %v89_v1 = vld [vmem:[%s10413_s1 + $0x188] sm:$0xff] }
  0x36   :  { %8056 = vmatpush3.msra.mxu0 %v82_v53  ;;  %8067 = vmatpush3.msra.mxu1 %v86_v54  ;;  %v95_v62 = vld [vmem:[%s10413_s1 + $0x1b8] sm:$0xff]  ;;  %v93_v3 = vld [vmem:[%s10413_s1 + $0x1a8] sm:$0xff]  ;;  %v88_v4 = vld [vmem:[%s10413_s1 + $0x180] sm:$0xff] }
  0x37   :  { %8057 = vmatprep.subr.mxu0 %v8802_v2  ;;  %8068 = vmatprep.subr.mxu1 %v8802_v2  ;;  %v92_v5 = vld [vmem:[%s10413_s1 + $0x1a0] sm:$0xff]  ;;  %v9184_v7 = vld [vmem:[%s10412_s0 + $0x68] sm:$0xff]  ;;  %v99_v8 = vld [vmem:[%s10413_s1 + $0x1d8] sm:$0xff] }
  0x38   :  { %8058 = vmatpush3.msra.mxu0 %v81_v55  ;;  %8069 = vmatpush3.msra.mxu1 %v85_v56  ;;  %v9175_v6 = vld [vmem:[%s10412_s0 + $0x60] sm:$0xff]  ;;  %v103_v11 = vld [vmem:[%s10413_s1 + $0x1f8] sm:$0xff]  ;;  %v98_v12 = vld [vmem:[%s10413_s1 + $0x1d0] sm:$0xff] }
  0x39   :  { %8059 = vmatprep.subr.mxu0 %v8802_v2  ;;  %8070 = vmatprep.subr.mxu1 %v8802_v2  ;;  %v102_v13 = vld [vmem:[%s10413_s1 + $0x1f0] sm:$0xff]  ;;  %v97_v14 = vld [vmem:[%s10413_s1 + $0x1c8] sm:$0xff]  ;;  %v96_v16 = vld [vmem:[%s10413_s1 + $0x1c0] sm:$0xff] }
  0x3a   :  { %8060 = vmatpush3.msra.mxu0 %v80_v57  ;;  %8061 = vmatprep.mubr.msk.f32.mxu0 %vm8803_vm1, %v8802_v2  ;;  %v101_v15 = vld [vmem:[%s10413_s1 + $0x1e8] sm:$0xff]  ;;  %v100_v17 = vld [vmem:[%s10413_s1 + $0x1e0] sm:$0xff]  ;;  %v9225_v18 = vld [vmem:[%s10412_s0 + $0x70] sm:$0xff] }
  0x3b   :  { %8071 = vmatpush3.msra.mxu1 %v84_v58  ;;  %8062 = vmatmul.mubr.msk.f32.vlgmr.msra.gmra.mxu0 %vm104_vm0, %v9125_v59  ;;  %v9234_v21 = vld [vmem:[%s10412_s0 + $0x78] sm:$0xff]  ;;  %v1275_v24 = vld [vmem:[%s10414_s2 + $0x10] sm:$0xff]  ;;  %v1274_v26 = vld [vmem:[%s10414_s2 + $0x8] sm:$0xff] }
  0x3c   :  { %8072 = vmatprep.mubr.msk.f32.mxu1 %vm8803_vm1, %v8802_v2  ;;  %8075 = vmatprep.subr.mxu0 %v8802_v2  ;;  %v1276_v22 = vld [vmem:[%s10414_s2 + $0x18] sm:$0xff]  ;;  %v1279_v25 = vld [vmem:[%s10414_s2 + $0x30] sm:$0xff]  ;;  %v1278_v27 = vld [vmem:[%s10414_s2 + $0x28] sm:$0xff] }
  0x3d   :  { %8086 = vmatprep.subr.mxu1 %v8802_v2  ;;  %8073 = vmatmul.mubr.msk.f32.vlgmr.msra.gmra.mxu1 %vm104_vm0, %v9134_v60  ;;  %v1280_v23 = vld [vmem:[%s10414_s2 + $0x38] sm:$0xff]  ;;  %v1273_v28 = vld [vmem:[%s10414_s2] sm:$0xff]  ;;  %v1283_v34 = vld [vmem:[%s10414_s2 + $0x50] sm:$0xff] }
  0x3e   :  { %8076 = vmatpush3.msra.mxu0 %v91_v61  ;;  %8087 = vmatpush3.msra.mxu1 %v95_v62  ;;  %v1277_v31 = vld [vmem:[%s10414_s2 + $0x20] sm:$0xff]  ;;  %v1284_v32 = vld [vmem:[%s10414_s2 + $0x58] sm:$0xff]  ;;  %v1287_v35 = vld [vmem:[%s10414_s2 + $0x70] sm:$0xff] }
  0x3f   :  { %8077 = vmatprep.subr.mxu0 %v8802_v2  ;;  %8088 = vmatprep.subr.mxu1 %v8802_v2  ;;  %v1288_v33 = vld [vmem:[%s10414_s2 + $0x78] sm:$0xff]  ;;  %v1282_v36 = vld [vmem:[%s10414_s2 + $0x48] sm:$0xff]  ;;  %v1281_v38 = vld [vmem:[%s10414_s2 + $0x40] sm:$0xff] }
  0x40   :  { %8078 = vmatpush3.msra.mxu0 %v90_v63  ;;  %8089 = vmatpush3.msra.mxu1 %v94_v0  ;;  %v1286_v37 = vld [vmem:[%s10414_s2 + $0x68] sm:$0xff]  ;;  %v1285_v41 = vld [vmem:[%s10414_s2 + $0x60] sm:$0xff]  ;;  %v1292_v42 = vld [vmem:[%s10414_s2 + $0x98] sm:$0xff] }
  0x41   :  { %8079 = vmatprep.subr.mxu0 %v8802_v2  ;;  %8090 = vmatprep.subr.mxu1 %v8802_v2  ;;  %v1296_v43 = vld [vmem:[%s10414_s2 + $0xb8] sm:$0xff]  ;;  %v1291_v44 = vld [vmem:[%s10414_s2 + $0x90] sm:$0xff]  ;;  %v1290_v46 = vld [vmem:[%s10414_s2 + $0x88] sm:$0xff] }
  0x42   :  { %8080 = vmatpush3.msra.mxu0 %v89_v1  ;;  %8091 = vmatpush3.msra.mxu1 %v93_v3  ;;  %v1295_v45 = vld [vmem:[%s10414_s2 + $0xb0] sm:$0xff]  ;;  %v1294_v47 = vld [vmem:[%s10414_s2 + $0xa8] sm:$0xff]  ;;  %v1289_v48 = vld [vmem:[%s10414_s2 + $0x80] sm:$0xff] }
  0x43   :  { %8081 = vmatprep.subr.mxu0 %v8802_v2  ;;  %8092 = vmatprep.subr.mxu1 %v8802_v2  ;;  %v1293_v51 = vld [vmem:[%s10414_s2 + $0xa0] sm:$0xff]  ;;  %v1300_v52 = vld [vmem:[%s10414_s2 + $0xd8] sm:$0xff]  ;;  %v1299_v54 = vld [vmem:[%s10414_s2 + $0xd0] sm:$0xff] }
  0x44   :  { %8082 = vmatpush3.msra.mxu0 %v88_v4  ;;  %8083 = vmatprep.mubr.msk.f32.mxu0 %vm8803_vm1, %v8802_v2  ;;  %v1304_v53 = vld [vmem:[%s10414_s2 + $0xf8] sm:$0xff]  ;;  %v1303_v55 = vld [vmem:[%s10414_s2 + $0xf0] sm:$0xff]  ;;  %v1298_v56 = vld [vmem:[%s10414_s2 + $0xc8] sm:$0xff] }
  0x45   :  { %8093 = vmatpush3.msra.mxu1 %v92_v5  ;;  %8084 = vmatmul.mubr.msk.f32.vlgmr.msra.gmra.mxu0 %vm104_vm0, %v9175_v6  ;;  %v1302_v57 = vld [vmem:[%s10414_s2 + $0xe8] sm:$0xff]  ;;  %v1297_v58 = vld [vmem:[%s10414_s2 + $0xc0] sm:$0xff]  ;;  %v1308_v62 = vld [vmem:[%s10414_s2 + $0x118] sm:$0xff] }
  0x46   :  { %8094 = vmatprep.mubr.msk.f32.mxu1 %vm8803_vm1, %v8802_v2  ;;  %8097 = vmatprep.subr.mxu0 %v8802_v2  ;;  %v1301_v61 = vld [vmem:[%s10414_s2 + $0xe0] sm:$0xff]  ;;  %v1312_v63 = vld [vmem:[%s10414_s2 + $0x138] sm:$0xff]  ;;  %v1307_v0 = vld [vmem:[%s10414_s2 + $0x110] sm:$0xff] }
  0x47   :  { %8108 = vmatprep.subr.mxu1 %v8802_v2  ;;  %8095 = vmatmul.mubr.msk.f32.vlgmr.msra.gmra.mxu1 %vm104_vm0, %v9184_v7  ;;  %v1311_v1 = vld [vmem:[%s10414_s2 + $0x130] sm:$0xff]  ;;  %v1306_v3 = vld [vmem:[%s10414_s2 + $0x108] sm:$0xff]  ;;  %v1305_v5 = vld [vmem:[%s10414_s2 + $0x100] sm:$0xff] }
  0x48   :  { %8098 = vmatpush3.msra.mxu0 %v99_v8  ;;  %8109 = vmatpush3.msra.mxu1 %v103_v11  ;;  %v1310_v4 = vld [vmem:[%s10414_s2 + $0x128] sm:$0xff]  ;;  %v1309_v8 = vld [vmem:[%s10414_s2 + $0x120] sm:$0xff]  ;;  %v1316_v11 = vld [vmem:[%s10414_s2 + $0x158] sm:$0xff] }
  0x49   :  { %8099 = vmatprep.subr.mxu0 %v8802_v2  ;;  %8110 = vmatprep.subr.mxu1 %v8802_v2 }
  0x4a   :  { %8100 = vmatpush3.msra.mxu0 %v98_v12  ;;  %8111 = vmatpush3.msra.mxu1 %v102_v13  ;;  %v1320_v12 = vld [vmem:[%s10414_s2 + $0x178] sm:$0xff]  ;;  %v1315_v13 = vld [vmem:[%s10414_s2 + $0x150] sm:$0xff] }
  0x4b   :  { %8101 = vmatprep.subr.mxu0 %v8802_v2  ;;  %8112 = vmatprep.subr.mxu1 %v8802_v2 }
  0x4c   :  { %8102 = vmatpush3.msra.mxu0 %v97_v14  ;;  %8113 = vmatpush3.msra.mxu1 %v101_v15  ;;  %v1319_v14 = vld [vmem:[%s10414_s2 + $0x170] sm:$0xff]  ;;  %v1314_v15 = vld [vmem:[%s10414_s2 + $0x148] sm:$0xff] }
  0x4d   :  { %8103 = vmatprep.subr.mxu0 %v8802_v2  ;;  %8114 = vmatprep.subr.mxu1 %v8802_v2 }
  0x4e   :  { %8104 = vmatpush3.msra.mxu0 %v96_v16  ;;  %8105 = vmatprep.mubr.msk.f32.mxu0 %vm8803_vm1, %v8802_v2  ;;  %v1318_v16 = vld [vmem:[%s10414_s2 + $0x168] sm:$0xff] }
  0x4f   :  { %8115 = vmatpush3.msra.mxu1 %v100_v17  ;;  %8106 = vmatmul.mubr.msk.f32.vlgmr.msra.gmra.mxu0 %vm104_vm0, %v9225_v18  ;;  %v1313_v17 = vld [vmem:[%s10414_s2 + $0x140] sm:$0xff] }
  0x50   :  { %8116 = vmatprep.mubr.msk.f32.mxu1 %vm8803_vm1, %v8802_v2  ;;  %8119 = vmatprep.subr.mxu0 %v8802_v2 }
  0x51   :  { %8130 = vmatprep.subr.mxu1 %v8802_v2  ;;  %8117 = vmatmul.mubr.msk.f32.vlgmr.msra.gmra.mxu1 %vm104_vm0, %v9234_v21 }
  0x52   :  { %8120 = vmatpush3.msra.mxu0 %v1276_v22  ;;  %8131 = vmatpush3.msra.mxu1 %v1280_v23  ;;  %v1317_v22 = vld [vmem:[%s10414_s2 + $0x160] sm:$0xff]  ;;  %v1324_v23 = vld [vmem:[%s10414_s2 + $0x198] sm:$0xff] }
  0x53   :  { %8121 = vmatprep.subr.mxu0 %v8802_v2  ;;  %8132 = vmatprep.subr.mxu1 %v8802_v2 }
  0x54   :  { %8122 = vmatpush3.msra.mxu0 %v1275_v24  ;;  %8133 = vmatpush3.msra.mxu1 %v1279_v25  ;;  %v1328_v24 = vld [vmem:[%s10414_s2 + $0x1b8] sm:$0xff]  ;;  %v1323_v25 = vld [vmem:[%s10414_s2 + $0x190] sm:$0xff] }
  0x55   :  { %8123 = vmatprep.subr.mxu0 %v8802_v2  ;;  %8134 = vmatprep.subr.mxu1 %v8802_v2 }
  0x56   :  { %8124 = vmatpush3.msra.mxu0 %v1274_v26  ;;  %8135 = vmatpush3.msra.mxu1 %v1278_v27  ;;  %v1327_v26 = vld [vmem:[%s10414_s2 + $0x1b0] sm:$0xff]  ;;  %v1322_v27 = vld [vmem:[%s10414_s2 + $0x188] sm:$0xff] }
  0x57   :  { %8125 = vmatprep.subr.mxu0 %v8802_v2  ;;  %8136 = vmatprep.subr.mxu1 %v8802_v2 }
  0x58   :  { %8126 = vmatpush3.msra.mxu0 %v1273_v28  ;;  %8127 = vmatprep.mubr.msk.f32.mxu0 %vm8803_vm1, %v8802_v2  ;;  %v1326_v28 = vld [vmem:[%s10414_s2 + $0x1a8] sm:$0xff] }
  0x59   :  { %8137 = vmatpush3.msra.mxu1 %v1277_v31  ;;  %8138 = vmatprep.mubr.msk.f32.mxu1 %vm8803_vm1, %v8802_v2  ;;  %v1321_v31 = vld [vmem:[%s10414_s2 + $0x180] sm:$0xff] }
  0x5a   :  { %8128 = vmatmul.mubr.msk.f32.vlgmr.msra.gmra.mxu0 %vm104_vm0, %v8875_v9  ;;  %8139 = vmatmul.mubr.msk.f32.vlgmr.msra.gmra.mxu1 %vm104_vm0, %v8884_v10 }
  0x5b   :  { %8141 = vmatprep.subr.mxu0 %v8802_v2  ;;  %8152 = vmatprep.subr.mxu1 %v8802_v2 }
  0x5c   :  { %8142 = vmatpush3.msra.mxu0 %v1284_v32  ;;  %8153 = vmatpush3.msra.mxu1 %v1288_v33  ;;  %v1325_v32 = vld [vmem:[%s10414_s2 + $0x1a0] sm:$0xff]  ;;  %v1332_v33 = vld [vmem:[%s10414_s2 + $0x1d8] sm:$0xff] }
  0x5d   :  { %8143 = vmatprep.subr.mxu0 %v8802_v2  ;;  %8154 = vmatprep.subr.mxu1 %v8802_v2 }
  0x5e   :  { %8144 = vmatpush3.msra.mxu0 %v1283_v34  ;;  %8155 = vmatpush3.msra.mxu1 %v1287_v35  ;;  %v1336_v34 = vld [vmem:[%s10414_s2 + $0x1f8] sm:$0xff]  ;;  %v1331_v35 = vld [vmem:[%s10414_s2 + $0x1d0] sm:$0xff] }
  0x5f   :  { %8145 = vmatprep.subr.mxu0 %v8802_v2  ;;  %8156 = vmatprep.subr.mxu1 %v8802_v2 }
  0x60   :  { %8146 = vmatpush3.msra.mxu0 %v1282_v36  ;;  %8157 = vmatpush3.msra.mxu1 %v1286_v37  ;;  %v1335_v36 = vld [vmem:[%s10414_s2 + $0x1f0] sm:$0xff]  ;;  %v1330_v37 = vld [vmem:[%s10414_s2 + $0x1c8] sm:$0xff] }
  0x61   :  { %8147 = vmatprep.subr.mxu0 %v8802_v2  ;;  %8158 = vmatprep.subr.mxu1 %v8802_v2 }
  0x62   :  { %8148 = vmatpush3.msra.mxu0 %v1281_v38  ;;  %8149 = vmatprep.mubr.msk.f32.mxu0 %vm8803_vm1, %v8802_v2  ;;  %v1334_v38 = vld [vmem:[%s10414_s2 + $0x1e8] sm:$0xff] }
  0x63   :  { %8159 = vmatpush3.msra.mxu1 %v1285_v41  ;;  %8160 = vmatprep.mubr.msk.f32.mxu1 %vm8803_vm1, %v8802_v2  ;;  %v1329_v41 = vld [vmem:[%s10414_s2 + $0x1c0] sm:$0xff] }
  0x64   :  { %8150 = vmatmul.mubr.msk.f32.vlgmr.msra.gmra.mxu0 %vm104_vm0, %v8925_v19  ;;  %8161 = vmatmul.mubr.msk.f32.vlgmr.msra.gmra.mxu1 %vm104_vm0, %v8934_v20 }
  0x65   :  { %8163 = vmatprep.subr.mxu0 %v8802_v2  ;;  %8174 = vmatprep.subr.mxu1 %v8802_v2 }
  0x66   :  { %8164 = vmatpush3.msra.mxu0 %v1292_v42  ;;  %8175 = vmatpush3.msra.mxu1 %v1296_v43  ;;  %v1333_v42 = vld [vmem:[%s10414_s2 + $0x1e0] sm:$0xff]  ;;  %v2460_v43 = vld [vmem:[%s10415_s3 + $0x18] sm:$0xff] }
  0x67   :  { %8165 = vmatprep.subr.mxu0 %v8802_v2  ;;  %8176 = vmatprep.subr.mxu1 %v8802_v2 }
  0x68   :  { %8166 = vmatpush3.msra.mxu0 %v1291_v44  ;;  %8177 = vmatpush3.msra.mxu1 %v1295_v45  ;;  %v2464_v44 = vld [vmem:[%s10415_s3 + $0x38] sm:$0xff]  ;;  %v2459_v45 = vld [vmem:[%s10415_s3 + $0x10] sm:$0xff] }
  0x69   :  { %8167 = vmatprep.subr.mxu0 %v8802_v2  ;;  %8178 = vmatprep.subr.mxu1 %v8802_v2 }
  0x6a   :  { %8168 = vmatpush3.msra.mxu0 %v1290_v46  ;;  %8179 = vmatpush3.msra.mxu1 %v1294_v47  ;;  %v2463_v46 = vld [vmem:[%s10415_s3 + $0x30] sm:$0xff]  ;;  %v2458_v47 = vld [vmem:[%s10415_s3 + $0x8] sm:$0xff] }
  0x6b   :  { %8169 = vmatprep.subr.mxu0 %v8802_v2  ;;  %8180 = vmatprep.subr.mxu1 %v8802_v2 }
  0x6c   :  { %8170 = vmatpush3.msra.mxu0 %v1289_v48  ;;  %8171 = vmatprep.mubr.msk.f32.mxu0 %vm8803_vm1, %v8802_v2  ;;  %v2462_v48 = vld [vmem:[%s10415_s3 + $0x28] sm:$0xff] }
  0x6d   :  { %8181 = vmatpush3.msra.mxu1 %v1293_v51  ;;  %8182 = vmatprep.mubr.msk.f32.mxu1 %vm8803_vm1, %v8802_v2  ;;  %v2457_v51 = vld [vmem:[%s10415_s3] sm:$0xff] }
  0x6e   :  { %8172 = vmatmul.mubr.msk.f32.vlgmr.msra.gmra.mxu0 %vm104_vm0, %v8975_v29  ;;  %8183 = vmatmul.mubr.msk.f32.vlgmr.msra.gmra.mxu1 %vm104_vm0, %v8984_v30 }
  0x6f   :  { %8185 = vmatprep.subr.mxu0 %v8802_v2  ;;  %8196 = vmatprep.subr.mxu1 %v8802_v2 }
  0x70   :  { %8186 = vmatpush3.msra.mxu0 %v1300_v52  ;;  %8197 = vmatpush3.msra.mxu1 %v1304_v53  ;;  %v2461_v52 = vld [vmem:[%s10415_s3 + $0x20] sm:$0xff]  ;;  %v2468_v53 = vld [vmem:[%s10415_s3 + $0x58] sm:$0xff] }
  0x71   :  { %8187 = vmatprep.subr.mxu0 %v8802_v2  ;;  %8198 = vmatprep.subr.mxu1 %v8802_v2 }
  0x72   :  { %8188 = vmatpush3.msra.mxu0 %v1299_v54  ;;  %8199 = vmatpush3.msra.mxu1 %v1303_v55  ;;  %v2472_v54 = vld [vmem:[%s10415_s3 + $0x78] sm:$0xff]  ;;  %v2467_v55 = vld [vmem:[%s10415_s3 + $0x50] sm:$0xff] }
  0x73   :  { %8189 = vmatprep.subr.mxu0 %v8802_v2  ;;  %8200 = vmatprep.subr.mxu1 %v8802_v2 }
  0x74   :  { %8190 = vmatpush3.msra.mxu0 %v1298_v56  ;;  %8201 = vmatpush3.msra.mxu1 %v1302_v57  ;;  %v2471_v56 = vld [vmem:[%s10415_s3 + $0x70] sm:$0xff]  ;;  %v2465_v57 = vld [vmem:[%s10415_s3 + $0x40] sm:$0xff] }
  0x75   :  { %8191 = vmatprep.subr.mxu0 %v8802_v2  ;;  %8202 = vmatprep.subr.mxu1 %v8802_v2 }
  0x76   :  { %8192 = vmatpush3.msra.mxu0 %v1297_v58  ;;  %8193 = vmatprep.mubr.msk.f32.mxu0 %vm8803_vm1, %v8802_v2  ;;  %v2469_v58 = vld [vmem:[%s10415_s3 + $0x60] sm:$0xff] }
  0x77   :  { %8203 = vmatpush3.msra.mxu1 %v1301_v61  ;;  %8204 = vmatprep.mubr.msk.f32.mxu1 %vm8803_vm1, %v8802_v2  ;;  %v2476_v61 = vld [vmem:[%s10415_s3 + $0x98] sm:$0xff] }
  0x78   :  { %8194 = vmatmul.mubr.msk.f32.vlgmr.msra.gmra.mxu0 %vm104_vm0, %v9025_v39  ;;  %8205 = vmatmul.mubr.msk.f32.vlgmr.msra.gmra.mxu1 %vm104_vm0, %v9034_v40 }
  0x79   :  { %8207 = vmatprep.subr.mxu0 %v8802_v2  ;;  %8218 = vmatprep.subr.mxu1 %v8802_v2 }
  0x7a   :  { %8208 = vmatpush3.msra.mxu0 %v1308_v62  ;;  %8219 = vmatpush3.msra.mxu1 %v1312_v63  ;;  %v2480_v62 = vld [vmem:[%s10415_s3 + $0xb8] sm:$0xff]  ;;  %v2475_v63 = vld [vmem:[%s10415_s3 + $0x90] sm:$0xff] }
  0x7b   :  { %8209 = vmatprep.subr.mxu0 %v8802_v2  ;;  %8220 = vmatprep.subr.mxu1 %v8802_v2 }
  0x7c   :  { %8210 = vmatpush3.msra.mxu0 %v1307_v0  ;;  %8221 = vmatpush3.msra.mxu1 %v1311_v1  ;;  %v2479_v0 = vld [vmem:[%s10415_s3 + $0xb0] sm:$0xff]  ;;  %v2473_v1 = vld [vmem:[%s10415_s3 + $0x80] sm:$0xff] }
  0x7d   :  { %8211 = vmatprep.subr.mxu0 %v8802_v2  ;;  %8222 = vmatprep.subr.mxu1 %v8802_v2 }
  0x7e   :  { %8212 = vmatpush3.msra.mxu0 %v1306_v3  ;;  %8223 = vmatpush3.msra.mxu1 %v1310_v4  ;;  %v2477_v3 = vld [vmem:[%s10415_s3 + $0xa0] sm:$0xff]  ;;  %v2484_v4 = vld [vmem:[%s10415_s3 + $0xd8] sm:$0xff] }
  0x7f   :  { %8213 = vmatprep.subr.mxu0 %v8802_v2  ;;  %8224 = vmatprep.subr.mxu1 %v8802_v2 }
  0x80   :  { %8214 = vmatpush3.msra.mxu0 %v1305_v5  ;;  %8215 = vmatprep.mubr.msk.f32.mxu0 %vm8803_vm1, %v8802_v2  ;;  %v2488_v5 = vld [vmem:[%s10415_s3 + $0xf8] sm:$0xff] }
  0x81   :  { %8225 = vmatpush3.msra.mxu1 %v1309_v8  ;;  %8226 = vmatprep.mubr.msk.f32.mxu1 %vm8803_vm1, %v8802_v2  ;;  %v2483_v8 = vld [vmem:[%s10415_s3 + $0xd0] sm:$0xff] }
  0x82   :  { %8216 = vmatmul.mubr.msk.f32.vlgmr.msra.gmra.mxu0 %vm104_vm0, %v9075_v49  ;;  %8227 = vmatmul.mubr.msk.f32.vlgmr.msra.gmra.mxu1 %vm104_vm0, %v9084_v50 }
  0x83   :  { %8229 = vmatprep.subr.mxu0 %v8802_v2  ;;  %8240 = vmatprep.subr.mxu1 %v8802_v2 }
  0x84   :  { %8230 = vmatpush3.msra.mxu0 %v1316_v11  ;;  %8241 = vmatpush3.msra.mxu1 %v1320_v12  ;;  %v2487_v11 = vld [vmem:[%s10415_s3 + $0xf0] sm:$0xff]  ;;  %v2481_v12 = vld [vmem:[%s10415_s3 + $0xc0] sm:$0xff] }
  0x85   :  { %8231 = vmatprep.subr.mxu0 %v8802_v2  ;;  %8242 = vmatprep.subr.mxu1 %v8802_v2 }
  0x86   :  { %8232 = vmatpush3.msra.mxu0 %v1315_v13  ;;  %8243 = vmatpush3.msra.mxu1 %v1319_v14  ;;  %v2485_v13 = vld [vmem:[%s10415_s3 + $0xe0] sm:$0xff]  ;;  %v2492_v14 = vld [vmem:[%s10415_s3 + $0x118] sm:$0xff] }
  0x87   :  { %8233 = vmatprep.subr.mxu0 %v8802_v2  ;;  %8244 = vmatprep.subr.mxu1 %v8802_v2 }
  0x88   :  { %8234 = vmatpush3.msra.mxu0 %v1314_v15  ;;  %8245 = vmatpush3.msra.mxu1 %v1318_v16  ;;  %v2496_v15 = vld [vmem:[%s10415_s3 + $0x138] sm:$0xff] }
  0x89   :  { %8235 = vmatprep.subr.mxu0 %v8802_v2  ;;  %8246 = vmatprep.subr.mxu1 %v8802_v2 }
  0x8a   :  { %8236 = vmatpush3.msra.mxu0 %v1313_v17  ;;  %8237 = vmatprep.mubr.msk.f32.mxu0 %vm8803_vm1, %v8802_v2  ;;  %v2491_v17 = vld [vmem:[%s10415_s3 + $0x110] sm:$0xff] }
  0x8b   :  { %8247 = vmatpush3.msra.mxu1 %v1317_v22  ;;  %8248 = vmatprep.mubr.msk.f32.mxu1 %vm8803_vm1, %v8802_v2  ;;  %v2495_v22 = vld [vmem:[%s10415_s3 + $0x130] sm:$0xff] }
  0x8c   :  { %8238 = vmatmul.mubr.msk.f32.vlgmr.msra.gmra.mxu0 %vm104_vm0, %v9125_v59  ;;  %8249 = vmatmul.mubr.msk.f32.vlgmr.msra.gmra.mxu1 %vm104_vm0, %v9134_v60 }
  0x8d   :  { %8251 = vmatprep.subr.mxu0 %v8802_v2  ;;  %8262 = vmatprep.subr.mxu1 %v8802_v2 }
  0x8e   :  { %8252 = vmatpush3.msra.mxu0 %v1324_v23  ;;  %8263 = vmatpush3.msra.mxu1 %v1328_v24 }
  0x8f   :  { %8253 = vmatprep.subr.mxu0 %v8802_v2  ;;  %8264 = vmatprep.subr.mxu1 %v8802_v2 }
  0x90   :  { %8254 = vmatpush3.msra.mxu0 %v1323_v25  ;;  %8265 = vmatpush3.msra.mxu1 %v1327_v26  ;;  %v2489_v26 = vld [vmem:[%s10415_s3 + $0x100] sm:$0xff] }
  0x91   :  { %8255 = vmatprep.subr.mxu0 %v8802_v2  ;;  %8266 = vmatprep.subr.mxu1 %v8802_v2 }
  0x92   :  { %8256 = vmatpush3.msra.mxu0 %v1322_v27  ;;  %8267 = vmatpush3.msra.mxu1 %v1326_v28  ;;  %v2493_v27 = vld [vmem:[%s10415_s3 + $0x120] sm:$0xff]  ;;  %v2500_v28 = vld [vmem:[%s10415_s3 + $0x158] sm:$0xff] }
  0x93   :  { %8257 = vmatprep.subr.mxu0 %v8802_v2  ;;  %8268 = vmatprep.subr.mxu1 %v8802_v2 }
  0x94   :  { %8258 = vmatpush3.msra.mxu0 %v1321_v31  ;;  %8259 = vmatprep.mubr.msk.f32.mxu0 %vm8803_vm1, %v8802_v2  ;;  %v2504_v31 = vld [vmem:[%s10415_s3 + $0x178] sm:$0xff] }
  0x95   :  { %8269 = vmatpush3.msra.mxu1 %v1325_v32  ;;  %8270 = vmatprep.mubr.msk.f32.mxu1 %vm8803_vm1, %v8802_v2 }
  0x96   :  { %8260 = vmatmul.mubr.msk.f32.vlgmr.msra.gmra.mxu0 %vm104_vm0, %v9175_v6  ;;  %8271 = vmatmul.mubr.msk.f32.vlgmr.msra.gmra.mxu1 %vm104_vm0, %v9184_v7 }
  0x97   :  { %8273 = vmatprep.subr.mxu0 %v8802_v2  ;;  %8284 = vmatprep.subr.mxu1 %v8802_v2 }
  0x98   :  { %8274 = vmatpush3.msra.mxu0 %v1332_v33  ;;  %8285 = vmatpush3.msra.mxu1 %v1336_v34  ;;  %v2499_v33 = vld [vmem:[%s10415_s3 + $0x150] sm:$0xff] }
  0x99   :  { %8275 = vmatprep.subr.mxu0 %v8802_v2  ;;  %8286 = vmatprep.subr.mxu1 %v8802_v2  ;;  %v2503_v34 = vld [vmem:[%s10415_s3 + $0x170] sm:$0xff] }
  0x9a   :  { %8276 = vmatpush3.msra.mxu0 %v1331_v35  ;;  %8287 = vmatpush3.msra.mxu1 %v1335_v36 }
  0x9b   :  { %8277 = vmatprep.subr.mxu0 %v8802_v2  ;;  %8288 = vmatprep.subr.mxu1 %v8802_v2 }
  0x9c   :  { %8278 = vmatpush3.msra.mxu0 %v1330_v37  ;;  %8289 = vmatpush3.msra.mxu1 %v1334_v38  ;;  %v2497_v38 = vld [vmem:[%s10415_s3 + $0x140] sm:$0xff] }
  0x9d   :  { %8279 = vmatprep.subr.mxu0 %v8802_v2  ;;  %8290 = vmatprep.subr.mxu1 %v8802_v2 }
  0x9e   :  { %8280 = vmatpush3.msra.mxu0 %v1329_v41  ;;  %8281 = vmatprep.mubr.msk.f32.mxu0 %vm8803_vm1, %v8802_v2  ;;  %v2501_v41 = vld [vmem:[%s10415_s3 + $0x160] sm:$0xff] }
  0x9f   :  { %8291 = vmatpush3.msra.mxu1 %v1333_v42  ;;  %8292 = vmatprep.mubr.msk.f32.mxu1 %vm8803_vm1, %v8802_v2  ;;  %v2508_v42 = vld [vmem:[%s10415_s3 + $0x198] sm:$0xff] }
  0xa0   :  { %8282 = vmatmul.mubr.msk.f32.vlgmr.msra.gmra.mxu0 %vm104_vm0, %v9225_v18  ;;  %8293 = vmatmul.mubr.msk.f32.vlgmr.msra.gmra.mxu1 %vm104_vm0, %v9234_v21 }
  0xa1   :  { %8295 = vmatprep.subr.mxu0 %v8802_v2  ;;  %8306 = vmatprep.subr.mxu1 %v8802_v2 }
  0xa2   :  { %8296 = vmatpush3.msra.mxu0 %v2460_v43  ;;  %8307 = vmatpush3.msra.mxu1 %v2464_v44  ;;  %v2512_v43 = vld [vmem:[%s10415_s3 + $0x1b8] sm:$0xff] }
  0xa3   :  { %8297 = vmatprep.subr.mxu0 %v8802_v2  ;;  %8308 = vmatprep.subr.mxu1 %v8802_v2 }
  0xa4   :  { %8298 = vmatpush3.msra.mxu0 %v2459_v45  ;;  %8309 = vmatpush3.msra.mxu1 %v2463_v46  ;;  %v2507_v45 = vld [vmem:[%s10415_s3 + $0x190] sm:$0xff] }
  0xa5   :  { %8299 = vmatprep.subr.mxu0 %v8802_v2  ;;  %8310 = vmatprep.subr.mxu1 %v8802_v2  ;;  %v2511_v46 = vld [vmem:[%s10415_s3 + $0x1b0] sm:$0xff] }
  0xa6   :  { %8300 = vmatpush3.msra.mxu0 %v2458_v47  ;;  %8311 = vmatpush3.msra.mxu1 %v2462_v48 }
  0xa7   :  { %8301 = vmatprep.subr.mxu0 %v8802_v2  ;;  %8312 = vmatprep.subr.mxu1 %v8802_v2 }
  0xa8   :  { %8302 = vmatpush3.msra.mxu0 %v2457_v51  ;;  %8313 = vmatpush3.msra.mxu1 %v2461_v52  ;;  %v2505_v52 = vld [vmem:[%s10415_s3 + $0x180] sm:$0xff] }
  0xa9   :  { %8303 = vmatprep.mubr.msk.f32.mxu0 %vm8803_vm1, %v8802_v2  ;;  %8314 = vmatprep.mubr.msk.f32.mxu1 %vm8803_vm1, %v8802_v2 }
  0xaa   :  { %8317 = vmatprep.subr.mxu0 %v8802_v2  ;;  %8328 = vmatprep.subr.mxu1 %v8802_v2 }
  0xab   :  { %8304 = vmatmul.mubr.msk.f32.vlgmr.msra.gmra.mxu0 %vm104_vm0, %v8875_v9  ;;  %8315 = vmatmul.mubr.msk.f32.vlgmr.msra.gmra.mxu1 %vm104_vm0, %v8884_v10  ;;  %v2466_v9 = vld [vmem:[%s10415_s3 + $0x48] sm:$0xff] }
  0xac   :  { %8318 = vmatpush3.msra.mxu0 %v2468_v53  ;;  %8329 = vmatpush3.msra.mxu1 %v2472_v54  ;;  %v2470_v10 = vld [vmem:[%s10415_s3 + $0x68] sm:$0xff]  ;;  %v2509_v53 = vld [vmem:[%s10415_s3 + $0x1a0] sm:$0xff]  ;;  %v2516_v54 = vld [vmem:[%s10415_s3 + $0x1d8] sm:$0xff] }
  0xad   :  { %8319 = vmatprep.subr.mxu0 %v8802_v2  ;;  %8330 = vmatprep.subr.mxu1 %v8802_v2 }
  0xae   :  { %8320 = vmatpush3.msra.mxu0 %v2467_v55  ;;  %8331 = vmatpush3.msra.mxu1 %v2471_v56  ;;  %v2520_v55 = vld [vmem:[%s10415_s3 + $0x1f8] sm:$0xff] }
  0xaf   :  { %8321 = vmatprep.subr.mxu0 %v8802_v2  ;;  %8332 = vmatprep.subr.mxu1 %v8802_v2 }
  0xb0   :  { %8322 = vmatpush3.msra.mxu0 %v2466_v9  ;;  %8333 = vmatpush3.msra.mxu1 %v2470_v10  ;;  %v2515_v9 = vld [vmem:[%s10415_s3 + $0x1d0] sm:$0xff] }
  0xb1   :  { %8323 = vmatprep.subr.mxu0 %v8802_v2  ;;  %8334 = vmatprep.subr.mxu1 %v8802_v2  ;;  %v2519_v10 = vld [vmem:[%s10415_s3 + $0x1f0] sm:$0xff] }
  0xb2   :  { %8324 = vmatpush3.msra.mxu0 %v2465_v57  ;;  %8335 = vmatpush3.msra.mxu1 %v2469_v58 }
  0xb3   :  { %8325 = vmatprep.mubr.msk.f32.mxu0 %vm8803_vm1, %v8802_v2  ;;  %8336 = vmatprep.mubr.msk.f32.mxu1 %vm8803_vm1, %v8802_v2 }
  0xb4   :  { %8339 = vmatprep.subr.mxu0 %v8802_v2  ;;  %8350 = vmatprep.subr.mxu1 %v8802_v2 }
  0xb5   :  { %8326 = vmatmul.mubr.msk.f32.vlgmr.msra.gmra.mxu0 %vm104_vm0, %v8925_v19  ;;  %8337 = vmatmul.mubr.msk.f32.vlgmr.msra.gmra.mxu1 %vm104_vm0, %v8934_v20  ;;  %v2474_v19 = vld [vmem:[%s10415_s3 + $0x88] sm:$0xff] }
  0xb6   :  { %8340 = vmatpush3.msra.mxu0 %v2476_v61  ;;  %8351 = vmatpush3.msra.mxu1 %v2480_v62  ;;  %v2478_v20 = vld [vmem:[%s10415_s3 + $0xa8] sm:$0xff]  ;;  %v2513_v62 = vld [vmem:[%s10415_s3 + $0x1c0] sm:$0xff] }
  0xb7   :  { %8341 = vmatprep.subr.mxu0 %v8802_v2  ;;  %8352 = vmatprep.subr.mxu1 %v8802_v2 }
  0xb8   :  { %8342 = vmatpush3.msra.mxu0 %v2475_v63  ;;  %8353 = vmatpush3.msra.mxu1 %v2479_v0  ;;  %v2517_v63 = vld [vmem:[%s10415_s3 + $0x1e0] sm:$0xff] }
  0xb9   :  { %8343 = vmatprep.subr.mxu0 %v8802_v2  ;;  %8354 = vmatprep.subr.mxu1 %v8802_v2 }
  0xba   :  { %8344 = vmatpush3.msra.mxu0 %v2474_v19  ;;  %8355 = vmatpush3.msra.mxu1 %v2478_v20 }
  0xbb   :  { %8345 = vmatprep.subr.mxu0 %v8802_v2  ;;  %8356 = vmatprep.subr.mxu1 %v8802_v2 }
  0xbc   :  { %8346 = vmatpush3.msra.mxu0 %v2473_v1  ;;  %8357 = vmatpush3.msra.mxu1 %v2477_v3 }
  0xbd   :  { %8347 = vmatprep.mubr.msk.f32.mxu0 %vm8803_vm1, %v8802_v2  ;;  %8358 = vmatprep.mubr.msk.f32.mxu1 %vm8803_vm1, %v8802_v2 }
  0xbe   :  { %8361 = vmatprep.subr.mxu0 %v8802_v2  ;;  %8372 = vmatprep.subr.mxu1 %v8802_v2 }
  0xbf   :  { %8348 = vmatmul.mubr.msk.f32.vlgmr.msra.gmra.mxu0 %vm104_vm0, %v8975_v29  ;;  %8359 = vmatmul.mubr.msk.f32.vlgmr.msra.gmra.mxu1 %vm104_vm0, %v8984_v30  ;;  %v2482_v29 = vld [vmem:[%s10415_s3 + $0xc8] sm:$0xff] }
  0xc0   :  { %8362 = vmatpush3.msra.mxu0 %v2484_v4  ;;  %8373 = vmatpush3.msra.mxu1 %v2488_v5  ;;  %v2486_v30 = vld [vmem:[%s10415_s3 + $0xe8] sm:$0xff] }
  0xc1   :  { %8363 = vmatprep.subr.mxu0 %v8802_v2  ;;  %8374 = vmatprep.subr.mxu1 %v8802_v2 }
  0xc2   :  { %8364 = vmatpush3.msra.mxu0 %v2483_v8  ;;  %8375 = vmatpush3.msra.mxu1 %v2487_v11 }
  0xc3   :  { %8365 = vmatprep.subr.mxu0 %v8802_v2  ;;  %8376 = vmatprep.subr.mxu1 %v8802_v2 }
  0xc4   :  { %8366 = vmatpush3.msra.mxu0 %v2482_v29  ;;  %8377 = vmatpush3.msra.mxu1 %v2486_v30 }
  0xc5   :  { %8367 = vmatprep.subr.mxu0 %v8802_v2  ;;  %8378 = vmatprep.subr.mxu1 %v8802_v2 }
  0xc6   :  { %8368 = vmatpush3.msra.mxu0 %v2481_v12  ;;  %8379 = vmatpush3.msra.mxu1 %v2485_v13 }
  0xc7   :  { %8369 = vmatprep.mubr.msk.f32.mxu0 %vm8803_vm1, %v8802_v2  ;;  %8380 = vmatprep.mubr.msk.f32.mxu1 %vm8803_vm1, %v8802_v2 }
  0xc8   :  { %8383 = vmatprep.subr.mxu0 %v8802_v2  ;;  %8394 = vmatprep.subr.mxu1 %v8802_v2 }
  0xc9   :  { %v9726_v16 = vpop.f32.mrf.mxu0  ;;  %8370 = vmatmul.mubr.msk.f32.vlgmr.msra.gmra.mxu0 %vm104_vm0, %v9025_v39  ;;  %8381 = vmatmul.mubr.msk.f32.vlgmr.msra.gmra.mxu1 %vm104_vm0, %v9034_v40  ;;  %v2490_v39 = vld [vmem:[%s10415_s3 + $0x108] sm:$0xff] }
  0xca   :  { %8384 = vmatpush3.msra.mxu0 %v2492_v14  ;;  %8395 = vmatpush3.msra.mxu1 %v2496_v15  ;;  %v2494_v40 = vld [vmem:[%s10415_s3 + $0x128] sm:$0xff] }
  0xcb   :  { %v9738_v23 = vpop.f32.mrf.mxu1  ;;  %v7953_v24 = vpop.f32.mrf.mxu0  ;;  %8385 = vmatprep.subr.mxu0 %v8802_v2  ;;  %8396 = vmatprep.subr.mxu1 %v8802_v2 }
  0xcc   :  { %8386 = vmatpush3.msra.mxu0 %v2491_v17  ;;  %8397 = vmatpush3.msra.mxu1 %v2495_v22 }
  0xcd   :  { %v7964_v25 = vpop.f32.mrf.mxu1  ;;  %8387 = vmatprep.subr.mxu0 %v8802_v2  ;;  %8398 = vmatprep.subr.mxu1 %v8802_v2 }
  0xce   :  { %8388 = vmatpush3.msra.mxu0 %v2490_v39  ;;  %8399 = vmatpush3.msra.mxu1 %v2494_v40 }
  0xcf   :  { %8389 = vmatprep.subr.mxu0 %v8802_v2  ;;  %8400 = vmatprep.subr.mxu1 %v8802_v2 }
  0xd0   :  { %8390 = vmatpush3.msra.mxu0 %v2489_v26  ;;  %8401 = vmatpush3.msra.mxu1 %v2493_v27 }
  0xd1   :  { %8391 = vmatprep.mubr.msk.f32.mxu0 %vm8803_vm1, %v8802_v2  ;;  %8402 = vmatprep.mubr.msk.f32.mxu1 %vm8803_vm1, %v8802_v2 }
  0xd2   :  { %8405 = vmatprep.subr.mxu0 %v8802_v2  ;;  %8416 = vmatprep.subr.mxu1 %v8802_v2 }
  0xd3   :  { %v9770_v32 = vpop.f32.mrf.mxu0  ;;  %8392 = vmatmul.mubr.msk.f32.vlgmr.msra.gmra.mxu0 %vm104_vm0, %v9075_v49  ;;  %8403 = vmatmul.mubr.msk.f32.vlgmr.msra.gmra.mxu1 %vm104_vm0, %v9084_v50  ;;  %v2498_v49 = vld [vmem:[%s10415_s3 + $0x148] sm:$0xff] }
  0xd4   :  { %8406 = vmatpush3.msra.mxu0 %v2500_v28  ;;  %8417 = vmatpush3.msra.mxu1 %v2504_v31  ;;  %v2502_v50 = vld [vmem:[%s10415_s3 + $0x168] sm:$0xff] }
  0xd5   :  { %v9782_v35 = vpop.f32.mrf.mxu1  ;;  %v7975_v36 = vpop.f32.mrf.mxu0  ;;  %8407 = vmatprep.subr.mxu0 %v8802_v2  ;;  %8418 = vmatprep.subr.mxu1 %v8802_v2 }
  0xd6   :  { %8408 = vmatpush3.msra.mxu0 %v2499_v33  ;;  %8419 = vmatpush3.msra.mxu1 %v2503_v34 }
  0xd7   :  { %v7986_v37 = vpop.f32.mrf.mxu1  ;;  %8409 = vmatprep.subr.mxu0 %v8802_v2  ;;  %8420 = vmatprep.subr.mxu1 %v8802_v2 }
  0xd8   :  { %8410 = vmatpush3.msra.mxu0 %v2498_v49  ;;  %8421 = vmatpush3.msra.mxu1 %v2502_v50 }
  0xd9   :  { %8411 = vmatprep.subr.mxu0 %v8802_v2  ;;  %8422 = vmatprep.subr.mxu1 %v8802_v2 }
  0xda   :  { %8412 = vmatpush3.msra.mxu0 %v2497_v38  ;;  %8423 = vmatpush3.msra.mxu1 %v2501_v41 }
  0xdb   :  { %8413 = vmatprep.mubr.msk.f32.mxu0 %vm8803_vm1, %v8802_v2  ;;  %8424 = vmatprep.mubr.msk.f32.mxu1 %vm8803_vm1, %v8802_v2 }
  0xdc   :  { %8427 = vmatprep.subr.mxu0 %v8802_v2  ;;  %8438 = vmatprep.subr.mxu1 %v8802_v2 }
  0xdd   :  { %v9814_v44 = vpop.f32.mrf.mxu0  ;;  %8414 = vmatmul.mubr.msk.f32.vlgmr.msra.gmra.mxu0 %vm104_vm0, %v9125_v59  ;;  %8425 = vmatmul.mubr.msk.f32.vlgmr.msra.gmra.mxu1 %vm104_vm0, %v9134_v60  ;;  %v2506_v59 = vld [vmem:[%s10415_s3 + $0x188] sm:$0xff] }
  0xde   :  { %8428 = vmatpush3.msra.mxu0 %v2508_v42  ;;  %8439 = vmatpush3.msra.mxu1 %v2512_v43  ;;  %v2510_v60 = vld [vmem:[%s10415_s3 + $0x1a8] sm:$0xff] }
  0xdf   :  { %v9826_v47 = vpop.f32.mrf.mxu1  ;;  %v7997_v48 = vpop.f32.mrf.mxu0  ;;  %8429 = vmatprep.subr.mxu0 %v8802_v2  ;;  %8440 = vmatprep.subr.mxu1 %v8802_v2 }
  0xe0   :  { %8430 = vmatpush3.msra.mxu0 %v2507_v45  ;;  %8441 = vmatpush3.msra.mxu1 %v2511_v46 }
  0xe1   :  { %v8008_v51 = vpop.f32.mrf.mxu1  ;;  %8431 = vmatprep.subr.mxu0 %v8802_v2  ;;  %8442 = vmatprep.subr.mxu1 %v8802_v2 }
  0xe2   :  { %8432 = vmatpush3.msra.mxu0 %v2506_v59  ;;  %8443 = vmatpush3.msra.mxu1 %v2510_v60 }
  0xe3   :  { %8433 = vmatprep.subr.mxu0 %v8802_v2  ;;  %8444 = vmatprep.subr.mxu1 %v8802_v2 }
  0xe4   :  { %8434 = vmatpush3.msra.mxu0 %v2505_v52  ;;  %8445 = vmatpush3.msra.mxu1 %v2509_v53 }
  0xe5   :  { %8435 = vmatprep.mubr.msk.f32.mxu0 %vm8803_vm1, %v8802_v2  ;;  %8446 = vmatprep.mubr.msk.f32.mxu1 %vm8803_vm1, %v8802_v2 }
  0xe6   :  { %8449 = vmatprep.subr.mxu0 %v8802_v2  ;;  %8460 = vmatprep.subr.mxu1 %v8802_v2 }
  0xe7   :  { %v9858_v56 = vpop.f32.mrf.mxu0  ;;  %8436 = vmatmul.mubr.msk.f32.vlgmr.msra.gmra.mxu0 %vm104_vm0, %v9175_v6  ;;  %8447 = vmatmul.mubr.msk.f32.vlgmr.msra.gmra.mxu1 %vm104_vm0, %v9184_v7  ;;  %v2514_v6 = vld [vmem:[%s10415_s3 + $0x1c8] sm:$0xff] }
  0xe8   :  { %8450 = vmatpush3.msra.mxu0 %v2516_v54  ;;  %8461 = vmatpush3.msra.mxu1 %v2520_v55  ;;  %v2518_v7 = vld [vmem:[%s10415_s3 + $0x1e8] sm:$0xff] }
  0xe9   :  { %v9870_v57 = vpop.f32.mrf.mxu1  ;;  %v8019_v58 = vpop.f32.mrf.mxu0  ;;  %8451 = vmatprep.subr.mxu0 %v8802_v2  ;;  %8462 = vmatprep.subr.mxu1 %v8802_v2 }
  0xea   :  { %8452 = vmatpush3.msra.mxu0 %v2515_v9  ;;  %8463 = vmatpush3.msra.mxu1 %v2519_v10 }
  0xeb   :  { %v8030_v61 = vpop.f32.mrf.mxu1  ;;  %8453 = vmatprep.subr.mxu0 %v8802_v2  ;;  %8464 = vmatprep.subr.mxu1 %v8802_v2 }
  0xec   :  { %8454 = vmatpush3.msra.mxu0 %v2514_v6  ;;  %8465 = vmatpush3.msra.mxu1 %v2518_v7 }
  0xed   :  { %8455 = vmatprep.subr.mxu0 %v8802_v2  ;;  %8466 = vmatprep.subr.mxu1 %v8802_v2 }
  0xee   :  { %8456 = vmatpush3.msra.mxu0 %v2513_v62  ;;  %8457 = vmatprep.mubr.msk.f32.mxu0 %vm8803_vm1, %v8802_v2 }
  0xef   :  { %8467 = vmatpush3.msra.mxu1 %v2517_v63  ;;  %8468 = vmatprep.mubr.msk.f32.mxu1 %vm8803_vm1, %v8802_v2 }
  0xf0   :  { %8458 = vmatmul.mubr.msk.f32.vlgmr.msra.gmra.mxu0 %vm104_vm0, %v9225_v18  ;;  %8469 = vmatmul.mubr.msk.f32.vlgmr.msra.gmra.mxu1 %vm104_vm0, %v9234_v21 }
  0xf1   :  { %v9898_v0 = vpop.f32.mrf.mxu0  ;;  %8471 = vmatprep.subr.mxu0 %v8802_v2  ;;  %8476 = vmatprep.subr.mxu1 %v8802_v2 }
  0xf2   :  { %8473 = vmatprep.mubr.msk.f32.mxu0 %vm8803_vm1, %v8802_v2  ;;  %8478 = vmatprep.mubr.msk.f32.mxu1 %vm8803_vm1, %v8802_v2 }
  0xf3   :  { %v9906_v19 = vpop.f32.mrf.mxu1  ;;  %v8041_v20 = vpop.f32.mrf.mxu0 }
  0xf5   :  { %v8052_v1 = vpop.f32.mrf.mxu1 }
  0xfb   :  { %v9908_v18 = vpop.f32.mrf.mxu0 }
  0xfd   :  { %v9910_v3 = vpop.f32.mrf.mxu1  ;;  %v8063_v21 = vpop.f32.mrf.mxu0 }
  0xff   :  { %v8074_v4 = vpop.f32.mrf.mxu1 }
 0x105   :  { %v9912_v5 = vpop.f32.mrf.mxu0 }
 0x107   :  { %v9914_v8 = vpop.f32.mrf.mxu1  ;;  %v8085_v11 = vpop.f32.mrf.mxu0 }
 0x109   :  { %v8096_v29 = vpop.f32.mrf.mxu1 }
 0x10f   :  { %v9916_v30 = vpop.f32.mrf.mxu0 }
 0x111   :  { %v9918_v12 = vpop.f32.mrf.mxu1  ;;  %v8107_v13 = vpop.f32.mrf.mxu0 }
 0x113   :  { %v8118_v14 = vpop.f32.mrf.mxu1 }
 0x11a   :  { %v1403_v15 = vpop.f32.mrf.mxu0  ;;  %v1473_v17 = vpop.f32.mrf.mxu1 }
 0x11b   :  { %8472 = vmatpush3.xpose.msk.msra.mxu0 %vm3641_vm2, %v1403_v15  ;;  %8477 = vmatpush3.xpose.msk.msra.mxu1 %vm3641_vm2, %v1473_v17 }
 0x11c   :  { %v8129_v22 = vpop.f32.mrf.mxu0  ;;  %v8140_v24 = vpop.f32.mrf.mxu1  ;;  %8481 = vmatprep.subr.mxu0 %v8802_v2  ;;  %8486 = vmatprep.subr.mxu1 %v8802_v2 }
 0x11e   :  { %8474 = vmatmul.mubr.msk.f32.vlgmr.msra.gmra.mxu0 %vm3641_vm2, %v9726_v16  ;;  %8479 = vmatmul.mubr.msk.f32.vlgmr.msra.gmra.mxu1 %vm3641_vm2, %v9738_v23 }
 0x11f   :  { %8483 = vmatprep.mubr.msk.f32.mxu0 %vm8803_vm1, %v8802_v2  ;;  %8488 = vmatprep.mubr.msk.f32.mxu1 %vm8803_vm1, %v8802_v2 }
 0x124   :  { %v1543_v39 = vpop.f32.mrf.mxu0  ;;  %v1613_v40 = vpop.f32.mrf.mxu1 }
 0x125   :  { %8482 = vmatpush3.xpose.msk.msra.mxu0 %vm3641_vm2, %v1543_v39  ;;  %8487 = vmatpush3.xpose.msk.msra.mxu1 %vm3641_vm2, %v1613_v40 }
 0x126   :  { %v8151_v25 = vpop.f32.mrf.mxu0  ;;  %v8162_v26 = vpop.f32.mrf.mxu1  ;;  %8491 = vmatprep.subr.mxu0 %v8802_v2  ;;  %8496 = vmatprep.subr.mxu1 %v8802_v2 }
 0x128   :  { %8484 = vmatmul.mubr.msk.f32.vlgmr.msra.gmra.mxu0 %vm3641_vm2, %v9770_v32  ;;  %8489 = vmatmul.mubr.msk.f32.vlgmr.msra.gmra.mxu1 %vm3641_vm2, %v9782_v35 }
 0x129   :  { %8493 = vmatprep.mubr.msk.f32.mxu0 %vm8803_vm1, %v8802_v2  ;;  %8498 = vmatprep.mubr.msk.f32.mxu1 %vm8803_vm1, %v8802_v2 }
 0x12e   :  { %v1683_v16 = vpop.f32.mrf.mxu0  ;;  %v1753_v23 = vpop.f32.mrf.mxu1 }
 0x12f   :  { %8492 = vmatpush3.xpose.msk.msra.mxu0 %vm3641_vm2, %v1683_v16  ;;  %8497 = vmatpush3.xpose.msk.msra.mxu1 %vm3641_vm2, %v1753_v23 }
 0x130   :  { %v8173_v27 = vpop.f32.mrf.mxu0  ;;  %v8184_v28 = vpop.f32.mrf.mxu1  ;;  %8501 = vmatprep.subr.mxu0 %v8802_v2  ;;  %8506 = vmatprep.subr.mxu1 %v8802_v2 }
 0x132   :  { %8494 = vmatmul.mubr.msk.f32.vlgmr.msra.gmra.mxu0 %vm3641_vm2, %v9814_v44  ;;  %8499 = vmatmul.mubr.msk.f32.vlgmr.msra.gmra.mxu1 %vm3641_vm2, %v9826_v47 }
 0x133   :  { %8503 = vmatprep.mubr.msk.f32.mxu0 %vm8803_vm1, %v8802_v2  ;;  %8508 = vmatprep.mubr.msk.f32.mxu1 %vm8803_vm1, %v8802_v2 }
 0x138   :  { %v1823_v31 = vpop.f32.mrf.mxu0  ;;  %v1893_v32 = vpop.f32.mrf.mxu1 }
 0x139   :  { %8502 = vmatpush3.xpose.msk.msra.mxu0 %vm3641_vm2, %v1823_v31  ;;  %8507 = vmatpush3.xpose.msk.msra.mxu1 %vm3641_vm2, %v1893_v32 }
 0x13a   :  { %v8195_v33 = vpop.f32.mrf.mxu0  ;;  %v8206_v34 = vpop.f32.mrf.mxu1  ;;  %8511 = vmatprep.subr.mxu0 %v8802_v2  ;;  %8516 = vmatprep.subr.mxu1 %v8802_v2 }
 0x13c   :  { %8504 = vmatmul.mubr.msk.f32.vlgmr.msra.gmra.mxu0 %vm3641_vm2, %v9858_v56  ;;  %8509 = vmatmul.mubr.msk.f32.vlgmr.msra.gmra.mxu1 %vm3641_vm2, %v9870_v57 }
 0x13d   :  { %8513 = vmatprep.mubr.msk.f32.mxu0 %vm8803_vm1, %v8802_v2  ;;  %8518 = vmatprep.mubr.msk.f32.mxu1 %vm8803_vm1, %v8802_v2 }
 0x142   :  { %v1963_v35 = vpop.f32.mrf.mxu0  ;;  %v2033_v36 = vpop.f32.mrf.mxu1 }
 0x143   :  { %8512 = vmatpush3.xpose.msk.msra.mxu0 %vm3641_vm2, %v1963_v35  ;;  %8517 = vmatpush3.xpose.msk.msra.mxu1 %vm3641_vm2, %v2033_v36 }
 0x144   :  { %v8217_v49 = vpop.f32.mrf.mxu0  ;;  %v8228_v50 = vpop.f32.mrf.mxu1  ;;  %8521 = vmatprep.subr.mxu0 %v8802_v2  ;;  %8526 = vmatprep.subr.mxu1 %v8802_v2 }
 0x146   :  { %8514 = vmatmul.mubr.msk.f32.vlgmr.msra.gmra.mxu0 %vm3641_vm2, %v9898_v0  ;;  %8519 = vmatmul.mubr.msk.f32.vlgmr.msra.gmra.mxu1 %vm3641_vm2, %v9906_v19 }
 0x147   :  { %8523 = vmatprep.mubr.msk.f32.mxu0 %vm8803_vm1, %v8802_v2  ;;  %8528 = vmatprep.mubr.msk.f32.mxu1 %vm8803_vm1, %v8802_v2 }
 0x14c   :  { %v2103_v37 = vpop.f32.mrf.mxu0  ;;  %v2173_v38 = vpop.f32.mrf.mxu1 }
 0x14d   :  { %8522 = vmatpush3.xpose.msk.msra.mxu0 %vm3641_vm2, %v2103_v37  ;;  %8527 = vmatpush3.xpose.msk.msra.mxu1 %vm3641_vm2, %v2173_v38 }
 0x14e   :  { %v8239_v41 = vpop.f32.mrf.mxu0  ;;  %v8250_v42 = vpop.f32.mrf.mxu1  ;;  %8531 = vmatprep.subr.mxu0 %v8802_v2  ;;  %8536 = vmatprep.subr.mxu1 %v8802_v2 }
 0x150   :  { %8524 = vmatmul.mubr.msk.f32.vlgmr.msra.gmra.mxu0 %vm3641_vm2, %v9908_v18  ;;  %8529 = vmatmul.mubr.msk.f32.vlgmr.msra.gmra.mxu1 %vm3641_vm2, %v9910_v3 }
 0x151   :  { %8533 = vmatprep.mubr.msk.f32.mxu0 %vm8803_vm1, %v8802_v2  ;;  %8538 = vmatprep.mubr.msk.f32.mxu1 %vm8803_vm1, %v8802_v2 }
 0x156   :  { %v2243_v43 = vpop.f32.mrf.mxu0  ;;  %v2313_v44 = vpop.f32.mrf.mxu1 }
 0x157   :  { %8532 = vmatpush3.xpose.msk.msra.mxu0 %vm3641_vm2, %v2243_v43  ;;  %8537 = vmatpush3.xpose.msk.msra.mxu1 %vm3641_vm2, %v2313_v44 }
 0x158   :  { %v8261_v45 = vpop.f32.mrf.mxu0  ;;  %v8272_v46 = vpop.f32.mrf.mxu1  ;;  %8541 = vmatprep.subr.mxu0 %v8802_v2  ;;  %8546 = vmatprep.subr.mxu1 %v8802_v2 }
 0x15a   :  { %8534 = vmatmul.mubr.msk.f32.vlgmr.msra.gmra.mxu0 %vm3641_vm2, %v9912_v5  ;;  %8539 = vmatmul.mubr.msk.f32.vlgmr.msra.gmra.mxu1 %vm3641_vm2, %v9914_v8 }
 0x15b   :  { %8543 = vmatprep.mubr.msk.f32.mxu0 %vm8803_vm1, %v8802_v2  ;;  %8548 = vmatprep.mubr.msk.f32.mxu1 %vm8803_vm1, %v8802_v2 }
 0x160   :  { %v2383_v47 = vpop.f32.mrf.mxu0  ;;  %v2453_v48 = vpop.f32.mrf.mxu1 }
 0x161   :  { %8542 = vmatpush3.xpose.msk.msra.mxu0 %vm3641_vm2, %v2383_v47  ;;  %8547 = vmatpush3.xpose.msk.msra.mxu1 %vm3641_vm2, %v2453_v48 }
 0x162   :  { %v8283_v59 = vpop.f32.mrf.mxu0  ;;  %v8294_v60 = vpop.f32.mrf.mxu1  ;;  %8551 = vmatprep.subr.mxu0 %v8802_v2  ;;  %8556 = vmatprep.subr.mxu1 %v8802_v2 }
 0x164   :  { %8544 = vmatmul.mubr.msk.f32.vlgmr.msra.gmra.mxu0 %vm3641_vm2, %v9916_v30  ;;  %8549 = vmatmul.mubr.msk.f32.vlgmr.msra.gmra.mxu1 %vm3641_vm2, %v9918_v12 }
 0x165   :  { %8553 = vmatprep.mubr.msk.f32.mxu0 %vm8803_vm1, %v8802_v2  ;;  %8558 = vmatprep.mubr.msk.f32.mxu1 %vm8803_vm1, %v8802_v2 }
 0x16b   :  { %v2587_v51 = vpop.f32.mrf.mxu0  ;;  %v2657_v52 = vpop.f32.mrf.mxu1 }
 0x16c   :  { %8552 = vmatpush3.msra.mxu0 %v2587_v51  ;;  %8557 = vmatpush3.msra.mxu1 %v2657_v52 }
 0x16d   :  { %v8305_v53 = vpop.f32.mrf.mxu0  ;;  %v8316_v54 = vpop.f32.mrf.mxu1  ;;  %8561 = vmatprep.subr.mxu0 %v8802_v2  ;;  %8566 = vmatprep.subr.mxu1 %v8802_v2 }
 0x175   :  { %v10018_v55 = vpop.f32.mrf.mxu0  ;;  %v10020_v56 = vpop.f32.mrf.mxu1 }
 0x177   :  { %v8327_v9 = vpop.f32.mrf.mxu0  ;;  %v8338_v10 = vpop.f32.mrf.mxu1 }
 0x17f   :  { %v10022_v57 = vpop.f32.mrf.mxu0  ;;  %v10024_v58 = vpop.f32.mrf.mxu1 }
 0x181   :  { %v8349_v6 = vpop.f32.mrf.mxu0  ;;  %v8360_v7 = vpop.f32.mrf.mxu1 }
 0x189   :  { %v10026_v61 = vpop.f32.mrf.mxu0  ;;  %v10028_v62 = vpop.f32.mrf.mxu1 }
 0x18b   :  { %v8371_v63 = vpop.f32.mrf.mxu0  ;;  %v8382_v0 = vpop.f32.mrf.mxu1 }
 0x193   :  { %v10030_v19 = vpop.f32.mrf.mxu0  ;;  %v10032_v20 = vpop.f32.mrf.mxu1 }
 0x195   :  { %v8393_v1 = vpop.f32.mrf.mxu0  ;;  %v8404_v18 = vpop.f32.mrf.mxu1 }
 0x19d   :  { %v10034_v3 = vpop.f32.mrf.mxu0  ;;  %v10036_v21 = vpop.f32.mrf.mxu1 }
 0x19f   :  { %v8415_v4 = vpop.f32.mrf.mxu0  ;;  %v8426_v5 = vpop.f32.mrf.mxu1 }
 0x1a7   :  { %v10038_v8 = vpop.f32.mrf.mxu0  ;;  %v10040_v11 = vpop.f32.mrf.mxu1 }
 0x1a9   :  { %v8437_v29 = vpop.f32.mrf.mxu0  ;;  %v8448_v30 = vpop.f32.mrf.mxu1 }
 0x1b0   :  { %v10042_v12 = vpop.f32.mrf.mxu0  ;;  %v10044_v13 = vpop.f32.mrf.mxu1 }
 0x1b2   :  { %v8459_v14 = vpop.f32.mrf.mxu0  ;;  %v8470_v15 = vpop.f32.mrf.mxu1 }
 0x1de   :  { %v10046_v17 = vpop.f32.mrf.mxu0  ;;  %v10048_v22 = vpop.f32.mrf.mxu1 }
 0x1df   :  { %v4859_v24 = vsel %vm4858_vm3, %v10046_v17, -inf  ;;  %v4862_v25 = vsel %vm4858_vm3, %v10048_v22, -inf }
 0x1e0   :  { %v8480_v39 = vpop.f32.mrf.mxu1  ;;  %4860 = vmax.xlane.f32.xlu0 %v4859_v24  ;;  %v8475_v40 = vpop.f32.mrf.mxu0 }
 0x1e4   :  { %4863 = vmax.xlane.f32.xlu0 %v4862_v25 }
 0x1e8   :  { %v10054_v26 = vpop.f32.mrf.mxu0  ;;  %v10056_v16 = vpop.f32.mrf.mxu1 }
 0x1e9   :  { %v4865_v23 = vsel %vm4858_vm3, %v10054_v26, -inf  ;;  %v4868_v31 = vsel %vm4858_vm3, %v10056_v16, -inf }
 0x1ea   :  { %v8490_v27 = vpop.f32.mrf.mxu1  ;;  %4866 = vmax.xlane.f32.xlu1 %v4865_v23  ;;  %v8485_v28 = vpop.f32.mrf.mxu0 }
 0x1ee   :  { %4869 = vmax.xlane.f32.xlu1 %v4868_v31 }
 0x1f2   :  { %v10062_v32 = vpop.f32.mrf.mxu0  ;;  %v10064_v33 = vpop.f32.mrf.mxu1 }
 0x1f3   :  { %v4874_v34 = vsel %vm4858_vm3, %v10064_v33, -inf  ;;  %v4871_v35 = vsel %vm4858_vm3, %v10062_v32, -inf }
 0x1f4   :  { %v8500_v36 = vpop.f32.mrf.mxu1  ;;  %4875 = vmax.xlane.f32.xlu1 %v4874_v34  ;;  %4872 = vmax.xlane.f32.xlu0 %v4871_v35  ;;  %v8495_v49 = vpop.f32.mrf.mxu0 }
 0x1fc   :  { %v10070_v50 = vpop.f32.mrf.mxu0  ;;  %v10072_v37 = vpop.f32.mrf.mxu1 }
 0x1fd   :  { %v4880_v38 = vsel %vm4858_vm3, %v10072_v37, -inf  ;;  %v4877_v41 = vsel %vm4858_vm3, %v10070_v50, -inf }
 0x1fe   :  { %v8510_v42 = vpop.f32.mrf.mxu1  ;;  %4881 = vmax.xlane.f32.xlu1 %v4880_v38  ;;  %4878 = vmax.xlane.f32.xlu0 %v4877_v41  ;;  %v8505_v43 = vpop.f32.mrf.mxu0 }
 0x206   :  { %v10078_v44 = vpop.f32.mrf.mxu0  ;;  %v10080_v45 = vpop.f32.mrf.mxu1 }
 0x207   :  { %v4886_v46 = vsel %vm4858_vm3, %v10080_v45, -inf  ;;  %v4883_v47 = vsel %vm4858_vm3, %v10078_v44, -inf }
 0x208   :  { %v8520_v48 = vpop.f32.mrf.mxu1  ;;  %4887 = vmax.xlane.f32.xlu1 %v4886_v46  ;;  %4884 = vmax.xlane.f32.xlu0 %v4883_v47  ;;  %v8515_v59 = vpop.f32.mrf.mxu0 }
 0x210   :  { %v10086_v60 = vpop.f32.mrf.mxu0  ;;  %v10088_v51 = vpop.f32.mrf.mxu1 }
 0x211   :  { %v4892_v52 = vsel %vm4858_vm3, %v10088_v51, -inf  ;;  %v4889_v53 = vsel %vm4858_vm3, %v10086_v60, -inf }
 0x212   :  { %v8530_v54 = vpop.f32.mrf.mxu1  ;;  %4893 = vmax.xlane.f32.xlu1 %v4892_v52  ;;  %4890 = vmax.xlane.f32.xlu0 %v4889_v53  ;;  %v8525_v9 = vpop.f32.mrf.mxu0 }
 0x21a   :  { %v10094_v10 = vpop.f32.mrf.mxu0  ;;  %v10096_v6 = vpop.f32.mrf.mxu1 }
 0x21b   :  { %v4898_v7 = vsel %vm4858_vm3, %v10096_v6, -inf  ;;  %v4895_v63 = vsel %vm4858_vm3, %v10094_v10, -inf }
 0x21c   :  { %v8540_v0 = vpop.f32.mrf.mxu1  ;;  %4899 = vmax.xlane.f32.xlu1 %v4898_v7  ;;  %4896 = vmax.xlane.f32.xlu0 %v4895_v63  ;;  %v8535_v1 = vpop.f32.mrf.mxu0 }
 0x224   :  { %v10102_v18 = vpop.f32.mrf.mxu0  ;;  %v10104_v4 = vpop.f32.mrf.mxu1 }
 0x225   :  { %v4904_v5 = vsel %vm4858_vm3, %v10104_v4, -inf  ;;  %v4901_v29 = vsel %vm4858_vm3, %v10102_v18, -inf }
 0x226   :  { %v8550_v30 = vpop.f32.mrf.mxu1  ;;  %4905 = vmax.xlane.f32.xlu1 %v4904_v5  ;;  %4902 = vmax.xlane.f32.xlu0 %v4901_v29  ;;  %v8545_v14 = vpop.f32.mrf.mxu0 }
 0x269   :  { %v4861_v15 = vpop.xlane.xlu0 %4860 }
 0x26a   :  { %v4907_v24 = vsub.f32 %v10046_v17, %v4861_v15 }
 0x26c   :  { %v4923_v39 = vmul.f32 1.442695, %v4907_v24 }
 0x26d   :  { %v4864_v40 = vpop.xlane.xlu0 %4863 }
 0x26e   :  { %8716 = vpow2.f32 %v4923_v39  ;;  %v4908_v25 = vsub.f32 %v10048_v22, %v4864_v40 }
 0x270   :  { %v4925_v23 = vmul.f32 1.442695, %v4908_v25 }
 0x272   :  { %8718 = vpow2.f32 %v4925_v23 }
 0x273   :  { %v4867_v27 = vpop.xlane.xlu1 %4866 }
 0x274   :  { %v4909_v28 = vsub.f32 %v10054_v26, %v4867_v27 }
 0x276   :  { %v4927_v31 = vmul.f32 1.442695, %v4909_v28 }
 0x277   :  { %v4870_v34 = vpop.xlane.xlu1 %4869 }
 0x278   :  { %8720 = vpow2.f32 %v4927_v31  ;;  %v4910_v35 = vsub.f32 %v10056_v16, %v4870_v34 }
 0x27a   :  { %v4929_v36 = vmul.f32 1.442695, %v4910_v35 }
 0x27b   :  { %v10114_v49 = vpop.eup %8716 }
 0x27c   :  { %8722 = vpow2.f32 %v4929_v36  ;;  %v4955_v17 = vsel %vm4858_vm3, %v10114_v49, 0.0 }
 0x27d   :  { %v4876_v38 = vpop.xlane.xlu1 %4875  ;;  %v4873_v41 = vpop.xlane.xlu0 %4872  ;;  %4956 = vadd.xlane.f32.xlu0 %v4955_v17 }
 0x27e   :  { %v4912_v22 = vsub.f32 %v10064_v33, %v4876_v38  ;;  %v4911_v42 = vsub.f32 %v10062_v32, %v4873_v41 }
 0x27f   :  { %v10120_v26 = vpop.eup %8718 }
 0x280   :  { %v4933_v43 = vmul.f32 1.442695, %v4912_v22  ;;  %v4931_v46 = vmul.f32 1.442695, %v4911_v42  ;;  %v4958_v16 = vsel %vm4858_vm3, %v10120_v26, 0.0 }
 0x281   :  { %4959 = vadd.xlane.f32.xlu1 %v4958_v16 }
 0x282   :  { %8724 = vpow2.f32 %v4933_v43 }
 0x283   :  { %8726 = vpow2.f32 %v4931_v46 }
 0x285   :  { %v10124_v47 = vpop.eup %8720 }
 0x286   :  { %v4961_v48 = vsel %vm4858_vm3, %v10124_v47, 0.0 }
 0x287   :  { %v4882_v59 = vpop.xlane.xlu1 %4881  ;;  %v4879_v52 = vpop.xlane.xlu0 %4878  ;;  %4962 = vadd.xlane.f32.xlu0 %v4961_v48 }
 0x288   :  { %v4914_v32 = vsub.f32 %v10072_v37, %v4882_v59  ;;  %v4913_v33 = vsub.f32 %v10070_v50, %v4879_v52 }
 0x289   :  { %v10130_v53 = vpop.eup %8722 }
 0x28a   :  { %v4937_v54 = vmul.f32 1.442695, %v4914_v32  ;;  %v4935_v9 = vmul.f32 1.442695, %v4913_v33  ;;  %v4964_v7 = vsel %vm4858_vm3, %v10130_v53, 0.0 }
 0x28b   :  { %4965 = vadd.xlane.f32.xlu1 %v4964_v7 }
 0x28c   :  { %8728 = vpow2.f32 %v4937_v54 }
 0x28d   :  { %8730 = vpow2.f32 %v4935_v9 }
 0x28f   :  { %v10134_v63 = vpop.eup %8724 }
 0x290   :  { %v10136_v0 = vpop.eup %8726  ;;  %v4970_v1 = vsel %vm4858_vm3, %v10134_v63, 0.0 }
 0x291   :  { %v4888_v37 = vpop.xlane.xlu1 %4887  ;;  %v4885_v5 = vpop.xlane.xlu0 %4884  ;;  %4971 = vadd.xlane.f32.xlu1 %v4970_v1  ;;  %v4967_v50 = vsel %vm4858_vm3, %v10136_v0, 0.0 }
 0x292   :  { %v4916_v29 = vsub.f32 %v10080_v45, %v4888_v37  ;;  %v4915_v30 = vsub.f32 %v10078_v44, %v4885_v5  ;;  %4968 = vadd.xlane.f32.xlu0 %v4967_v50 }
 0x294   :  { %v4941_v14 = vmul.f32 1.442695, %v4916_v29  ;;  %v4939_v15 = vmul.f32 1.442695, %v4915_v30 }
 0x296   :  { %8732 = vpow2.f32 %v4941_v14 }
 0x297   :  { %8734 = vpow2.f32 %v4939_v15 }
 0x299   :  { %v10144_v24 = vpop.eup %8728 }
 0x29a   :  { %v10146_v39 = vpop.eup %8730  ;;  %v4976_v40 = vsel %vm4858_vm3, %v10144_v24, 0.0 }
 0x29b   :  { %v4894_v25 = vpop.xlane.xlu1 %4893  ;;  %v4891_v23 = vpop.xlane.xlu0 %4890  ;;  %4977 = vadd.xlane.f32.xlu1 %v4976_v40  ;;  %v4973_v45 = vsel %vm4858_vm3, %v10146_v39, 0.0 }
 0x29c   :  { %v4918_v44 = vsub.f32 %v10088_v51, %v4894_v25  ;;  %v4917_v27 = vsub.f32 %v10086_v60, %v4891_v23  ;;  %4974 = vadd.xlane.f32.xlu0 %v4973_v45 }
 0x29e   :  { %v4945_v28 = vmul.f32 1.442695, %v4918_v44  ;;  %v4943_v31 = vmul.f32 1.442695, %v4917_v27 }
 0x2a0   :  { %8736 = vpow2.f32 %v4945_v28 }
 0x2a1   :  { %8738 = vpow2.f32 %v4943_v31 }
 0x2a3   :  { %v10154_v34 = vpop.eup %8732 }
 0x2a4   :  { %v10156_v35 = vpop.eup %8734  ;;  %v4982_v36 = vsel %vm4858_vm3, %v10154_v34, 0.0 }
 0x2a5   :  { %v4900_v17 = vpop.xlane.xlu1 %4899  ;;  %v4897_v38 = vpop.xlane.xlu0 %4896  ;;  %4983 = vadd.xlane.f32.xlu1 %v4982_v36  ;;  %v4979_v51 = vsel %vm4858_vm3, %v10156_v35, 0.0 }
 0x2a6   :  { %v4920_v60 = vsub.f32 %v10096_v6, %v4900_v17  ;;  %v4919_v41 = vsub.f32 %v10094_v10, %v4897_v38  ;;  %4980 = vadd.xlane.f32.xlu0 %v4979_v51 }
 0x2a8   :  { %v4949_v22 = vmul.f32 1.442695, %v4920_v60  ;;  %v4947_v42 = vmul.f32 1.442695, %v4919_v41 }
 0x2aa   :  { %8740 = vpow2.f32 %v4949_v22 }
 0x2ab   :  { %8742 = vpow2.f32 %v4947_v42 }
 0x2ad   :  { %v10164_v43 = vpop.eup %8736 }
 0x2ae   :  { %v10166_v46 = vpop.eup %8738  ;;  %v4988_v16 = vsel %vm4858_vm3, %v10164_v43, 0.0 }
 0x2af   :  { %v4906_v48 = vpop.xlane.xlu1 %4905  ;;  %v4903_v59 = vpop.xlane.xlu0 %4902  ;;  %4989 = vadd.xlane.f32.xlu1 %v4988_v16  ;;  %v4985_v6 = vsel %vm4858_vm3, %v10166_v46, 0.0 }
 0x2b0   :  { %v4922_v10 = vsub.f32 %v10104_v4, %v4906_v48  ;;  %v4921_v52 = vsub.f32 %v10102_v18, %v4903_v59  ;;  %4986 = vadd.xlane.f32.xlu0 %v4985_v6  ;;  %v6203_v59 = vld [vmem:[%s10416_s4] sm:$0xf]  ;;  %v6205_v6 = vld [vmem:[%s10416_s4 + $0x8] sm:$0xf] }
 0x2b2   :  { %v4953_v32 = vmul.f32 1.442695, %v4922_v10  ;;  %v4951_v33 = vmul.f32 1.442695, %v4921_v52 }
 0x2b4   :  { %8744 = vpow2.f32 %v4953_v32  ;;  %v6206_v32 = vld [vmem:[%s10416_s4 + $0xc] sm:$0xf] }
 0x2b5   :  { %8746 = vpow2.f32 %v4951_v33 }
 0x2b7   :  { %v10174_v54 = vpop.eup %8740 }
 0x2b8   :  { %v10176_v9 = vpop.eup %8742  ;;  %v4994_v7 = vsel %vm4858_vm3, %v10174_v54, 0.0 }
 0x2b9   :  { %4995 = vadd.xlane.f32.xlu1 %v4994_v7  ;;  %v4991_v1 = vsel %vm4858_vm3, %v10176_v9, 0.0 }
 0x2ba   :  { %4992 = vadd.xlane.f32.xlu0 %v4991_v1 }
 0x2c1   :  { %v10182_v4 = vpop.eup %8744 }
 0x2c2   :  { %v10184_v18 = vpop.eup %8746  ;;  %v5000_v37 = vsel %vm4858_vm3, %v10182_v4, 0.0 }
 0x2c3   :  { %5001 = vadd.xlane.f32.xlu1 %v5000_v37  ;;  %v4997_v5 = vsel %vm4858_vm3, %v10184_v18, 0.0 }
 0x2c4   :  { %4998 = vadd.xlane.f32.xlu0 %v4997_v5  ;;  %v6210_v5 = vld [vmem:[%s10416_s4 + $0x1c] sm:$0xf] }
 0x306   :  { %v4957_v50 = vpop.xlane.xlu0 %4956 }
 0x307   :  { %8748 = vrcp.f32 %v4957_v50 }
 0x30a   :  { %v4960_v29 = vpop.xlane.xlu1 %4959 }
 0x30b   :  { %8750 = vrcp.f32 %v4960_v29  ;;  %v6209_v29 = vld [vmem:[%s10416_s4 + $0x18] sm:$0xf] }
 0x310   :  { %v4963_v30 = vpop.xlane.xlu0 %4962 }
 0x311   :  { %8752 = vrcp.f32 %v4963_v30 }
 0x314   :  { %v8749_v14 = vpop.eup %8748  ;;  %v4966_v15 = vpop.xlane.xlu1 %4965 }
 0x315   :  { %8754 = vrcp.f32 %v4966_v15  ;;  %v5019_v40 = vmul.f32 %v8749_v14, %v10114_v49 }
 0x317   :  { %8554 = vmatmul.mubr.msk.f32.vlgmr.msra.gmra.mxu0 %vm4858_vm3, %v5019_v40  ;;  %v6212_v40 = vld [vmem:[%s10416_s4 + $0x24] sm:$0xf] }
 0x318   :  { %v8751_v25 = vpop.eup %8750  ;;  %8562 = vmatpush3.msra.mxu0 %v10018_v55  ;;  %8563 = vmatprep.mubr.msk.f32.mxu0 %vm8803_vm1, %v8802_v2 }
 0x319   :  { %v5020_v23 = vmul.f32 %v8751_v25, %v10120_v26  ;;  %8571 = vmatprep.subr.mxu0 %v8802_v2 }
 0x31a   :  { %v4972_v45 = vpop.xlane.xlu1 %4971 }
 0x31b   :  { %8756 = vrcp.f32 %v4972_v45  ;;  %v4969_v44 = vpop.xlane.xlu0 %4968  ;;  %8559 = vmatmul.mubr.msk.f32.vlgmr.msra.gmra.mxu1 %vm4858_vm3, %v5020_v23  ;;  %v6211_v23 = vld [vmem:[%s10416_s4 + $0x20] sm:$0xf] }
 0x31c   :  { %8758 = vrcp.f32 %v4969_v44  ;;  %8567 = vmatpush3.msra.mxu1 %v10020_v56  ;;  %8568 = vmatprep.mubr.msk.f32.mxu1 %vm8803_vm1, %v8802_v2 }
 0x31d   :  { %8576 = vmatprep.subr.mxu1 %v8802_v2 }
 0x31e   :  { %v8753_v55 = vpop.eup %8752 }
 0x31f   :  { %v5021_v49 = vmul.f32 %v8753_v55, %v10124_v47 }
 0x321   :  { %8564 = vmatmul.mubr.msk.f32.vlgmr.msra.gmra.mxu0 %vm4858_vm3, %v5021_v49  ;;  %v6214_v49 = vld [vmem:[%s10416_s4 + $0x2c] sm:$0xf] }
 0x322   :  { %v8755_v26 = vpop.eup %8754  ;;  %8572 = vmatpush3.msra.mxu0 %v10022_v57  ;;  %8573 = vmatprep.mubr.msk.f32.mxu0 %vm8803_vm1, %v8802_v2 }
 0x323   :  { %v5022_v27 = vmul.f32 %v8755_v26, %v10130_v53  ;;  %8581 = vmatprep.subr.mxu0 %v8802_v2 }
 0x324   :  { %v4978_v56 = vpop.xlane.xlu1 %4977 }
 0x325   :  { %8760 = vrcp.f32 %v4978_v56  ;;  %v4975_v28 = vpop.xlane.xlu0 %4974  ;;  %8569 = vmatmul.mubr.msk.f32.vlgmr.msra.gmra.mxu1 %vm4858_vm3, %v5022_v27  ;;  %v6213_v27 = vld [vmem:[%s10416_s4 + $0x28] sm:$0xf] }
 0x326   :  { %8762 = vrcp.f32 %v4975_v28  ;;  %8577 = vmatpush3.msra.mxu1 %v10024_v58  ;;  %8578 = vmatprep.mubr.msk.f32.mxu1 %vm8803_vm1, %v8802_v2 }
 0x327   :  { %8586 = vmatprep.subr.mxu1 %v8802_v2 }
 0x328   :  { %v8757_v57 = vpop.eup %8756 }
 0x329   :  { %v8759_v47 = vpop.eup %8758  ;;  %v5024_v31 = vmul.f32 %v8757_v57, %v10134_v63 }
 0x32a   :  { %v5023_v53 = vmul.f32 %v8759_v47, %v10136_v0  ;;  %v6216_v47 = vld [vmem:[%s10416_s4 + $0x34] sm:$0xf] }
 0x32b   :  { %8579 = vmatmul.mubr.msk.f32.vlgmr.msra.gmra.mxu1 %vm4858_vm3, %v5024_v31 }
 0x32c   :  { %8574 = vmatmul.mubr.msk.f32.vlgmr.msra.gmra.mxu0 %vm4858_vm3, %v5023_v53  ;;  %8587 = vmatpush3.msra.mxu1 %v10028_v62  ;;  %v6215_v53 = vld [vmem:[%s10416_s4 + $0x30] sm:$0xf] }
 0x32d   :  { %8582 = vmatpush3.msra.mxu0 %v10026_v61  ;;  %8588 = vmatprep.mubr.msk.f32.mxu1 %vm8803_vm1, %v8802_v2 }
 0x32e   :  { %v4984_v58 = vpop.xlane.xlu1 %4983  ;;  %8596 = vmatprep.subr.mxu1 %v8802_v2  ;;  %8583 = vmatprep.mubr.msk.f32.mxu0 %vm8803_vm1, %v8802_v2 }
 0x32f   :  { %8764 = vrcp.f32 %v4984_v58  ;;  %v4981_v63 = vpop.xlane.xlu0 %4980  ;;  %8591 = vmatprep.subr.mxu0 %v8802_v2 }
 0x330   :  { %8766 = vrcp.f32 %v4981_v63 }
 0x332   :  { %v8761_v0 = vpop.eup %8760 }
 0x333   :  { %v8763_v36 = vpop.eup %8762  ;;  %v5026_v62 = vmul.f32 %v8761_v0, %v10144_v24 }
 0x334   :  { %v5025_v61 = vmul.f32 %v8763_v36, %v10146_v39  ;;  %v6218_v36 = vld [vmem:[%s10416_s4 + $0x3c] sm:$0xf] }
 0x335   :  { %8589 = vmatmul.mubr.msk.f32.vlgmr.msra.gmra.mxu1 %vm4858_vm3, %v5026_v62 }
 0x336   :  { %8584 = vmatmul.mubr.msk.f32.vlgmr.msra.gmra.mxu0 %vm4858_vm3, %v5025_v61  ;;  %8597 = vmatpush3.msra.mxu1 %v10032_v20  ;;  %v6217_v61 = vld [vmem:[%s10416_s4 + $0x38] sm:$0xf] }
 0x337   :  { %8592 = vmatpush3.msra.mxu0 %v10030_v19  ;;  %8598 = vmatprep.mubr.msk.f32.mxu1 %vm8803_vm1, %v8802_v2 }
 0x338   :  { %v4990_v17 = vpop.xlane.xlu1 %4989  ;;  %8606 = vmatprep.subr.mxu1 %v8802_v2  ;;  %8593 = vmatprep.mubr.msk.f32.mxu0 %vm8803_vm1, %v8802_v2 }
 0x339   :  { %8768 = vrcp.f32 %v4990_v17  ;;  %v4987_v24 = vpop.xlane.xlu0 %4986  ;;  %8601 = vmatprep.subr.mxu0 %v8802_v2 }
 0x33a   :  { %8770 = vrcp.f32 %v4987_v24 }
 0x33c   :  { %v8765_v39 = vpop.eup %8764 }
 0x33d   :  { %v8767_v38 = vpop.eup %8766  ;;  %v5028_v20 = vmul.f32 %v8765_v39, %v10154_v34 }
 0x33e   :  { %v5027_v19 = vmul.f32 %v8767_v38, %v10156_v35 }
 0x33f   :  { %8599 = vmatmul.mubr.msk.f32.vlgmr.msra.gmra.mxu1 %vm4858_vm3, %v5028_v20 }
 0x340   :  { %8594 = vmatmul.mubr.msk.f32.vlgmr.msra.gmra.mxu0 %vm4858_vm3, %v5027_v19  ;;  %8607 = vmatpush3.msra.mxu1 %v10036_v21 }
 0x341   :  { %8602 = vmatpush3.msra.mxu0 %v10034_v3  ;;  %8608 = vmatprep.mubr.msk.f32.mxu1 %vm8803_vm1, %v8802_v2 }
 0x342   :  { %v4996_v51 = vpop.xlane.xlu1 %4995  ;;  %8616 = vmatprep.subr.mxu1 %v8802_v2  ;;  %8603 = vmatprep.mubr.msk.f32.mxu0 %vm8803_vm1, %v8802_v2 }
 0x343   :  { %8772 = vrcp.f32 %v4996_v51  ;;  %v4993_v34 = vpop.xlane.xlu0 %4992  ;;  %8611 = vmatprep.subr.mxu0 %v8802_v2 }
 0x344   :  { %8774 = vrcp.f32 %v4993_v34 }
 0x346   :  { %v8769_v35 = vpop.eup %8768 }
 0x347   :  { %v8771_v60 = vpop.eup %8770  ;;  %v5030_v21 = vmul.f32 %v8769_v35, %v10164_v43 }
 0x348   :  { %v5029_v3 = vmul.f32 %v8771_v60, %v10166_v46 }
 0x349   :  { %8609 = vmatmul.mubr.msk.f32.vlgmr.msra.gmra.mxu1 %vm4858_vm3, %v5030_v21 }
 0x34a   :  { %8604 = vmatmul.mubr.msk.f32.vlgmr.msra.gmra.mxu0 %vm4858_vm3, %v5029_v3  ;;  %8617 = vmatpush3.msra.mxu1 %v10040_v11 }
 0x34b   :  { %8612 = vmatpush3.msra.mxu0 %v10038_v8  ;;  %8613 = vmatprep.mubr.msk.f32.mxu0 %vm8803_vm1, %v8802_v2 }
 0x34c   :  { %v5002_v41 = vpop.xlane.xlu1 %5001  ;;  %8618 = vmatprep.mubr.msk.f32.mxu1 %vm8803_vm1, %v8802_v2  ;;  %8621 = vmatprep.subr.mxu0 %v8802_v2 }
 0x34d   :  { %8776 = vrcp.f32 %v5002_v41  ;;  %v4999_v22 = vpop.xlane.xlu0 %4998  ;;  %8626 = vmatprep.subr.mxu1 %v8802_v2 }
 0x34e   :  { %8778 = vrcp.f32 %v4999_v22 }
 0x350   :  { %v8773_v42 = vpop.eup %8772 }
 0x351   :  { %v8775_v43 = vpop.eup %8774  ;;  %v5032_v11 = vmul.f32 %v8773_v42, %v10174_v54 }
 0x352   :  { %v5031_v8 = vmul.f32 %v8775_v43, %v10176_v9  ;;  %v6207_v9 = vld [vmem:[%s10416_s4 + $0x10] sm:$0xf] }
 0x353   :  { %8619 = vmatmul.mubr.msk.f32.vlgmr.msra.gmra.mxu1 %vm4858_vm3, %v5032_v11 }
 0x354   :  { %8614 = vmatmul.mubr.msk.f32.vlgmr.msra.gmra.mxu0 %vm4858_vm3, %v5031_v8  ;;  %8627 = vmatpush3.msra.mxu1 %v10044_v13  ;;  %v6204_v13 = vld [vmem:[%s10416_s4 + $0x4] sm:$0xf] }
 0x355   :  { %8622 = vmatpush3.msra.mxu0 %v10042_v12  ;;  %8623 = vmatprep.mubr.msk.f32.mxu0 %vm8803_vm1, %v8802_v2 }
 0x356   :  { %8628 = vmatprep.mubr.msk.f32.mxu1 %vm8803_vm1, %v8802_v2  ;;  %8631 = vmatprep.subr.mxu0 %v8802_v2 }
 0x357   :  { %8636 = vmatprep.subr.mxu1 %v8802_v2 }
 0x35a   :  { %v8777_v46 = vpop.eup %8776 }
 0x35b   :  { %v8779_v16 = vpop.eup %8778  ;;  %v5034_v48 = vmul.f32 %v8777_v46, %v10182_v4  ;;  %v6208_v4 = vld [vmem:[%s10416_s4 + $0x14] sm:$0xf] }
 0x35c   :  { %v5033_v12 = vmul.f32 %v8779_v16, %v10184_v18 }
 0x35d   :  { %8629 = vmatmul.mubr.msk.f32.vlgmr.msra.gmra.mxu1 %vm4858_vm3, %v5034_v48 }
 0x35e   :  { %8624 = vmatmul.mubr.msk.f32.vlgmr.msra.gmra.mxu0 %vm4858_vm3, %v5033_v12  ;;  %8637 = vmatpush3.msk.msra.mxu1 %vm6222_vm4, %v6204_v13 }
 0x35f   :  { %8632 = vmatpush3.msk.msra.mxu0 %vm6222_vm4, %v6203_v59  ;;  %8633 = vmatprep.mubr.msk.f32.mxu0 %vm8803_vm1, %v8802_v2 }
 0x360   :  { %8638 = vmatprep.mubr.msk.f32.mxu1 %vm8803_vm1, %v8802_v2  ;;  %8641 = vmatprep.subr.mxu0 %v8802_v2 }
 0x361   :  { %8646 = vmatprep.subr.mxu1 %v8802_v2 }
 0x3d7   :  { %v5104_v10 = vpop.f32.mrf.mxu0 }
 0x3d8   :  { %8634 = vmatmul.mubr.msk.f32.vlgmr.msra.gmra.mxu0 %vm3641_vm2, %v5104_v10 }
 0x3d9   :  { %v8555_v52 = vpop.f32.mrf.mxu0  ;;  %8642 = vmatpush3.msk.msra.mxu0 %vm6222_vm4, %v6205_v6  ;;  %8643 = vmatprep.mubr.msk.f32.mxu0 %vm8803_vm1, %v8802_v2 }
 0x3da   :  { %8651 = vmatprep.subr.mxu0 %v8802_v2 }
 0x3db   :  { %v5177_v33 = vpop.f32.mrf.mxu1 }
 0x3dc   :  { %8639 = vmatmul.mubr.msk.f32.vlgmr.msra.gmra.mxu1 %vm3641_vm2, %v5177_v33 }
 0x3dd   :  { %v8560_v54 = vpop.f32.mrf.mxu1  ;;  %8647 = vmatpush3.msk.msra.mxu1 %vm6222_vm4, %v6206_v32  ;;  %8648 = vmatprep.mubr.msk.f32.mxu1 %vm8803_vm1, %v8802_v2  ;;  %v7606_v32 = vld [vmem:[%s10417_s5] ss:$0 sm:$0xff]  ;;  %s8804_s5 = smov [#allocation2]  }
 0x3de   :  { %8656 = vmatprep.subr.mxu1 %v8802_v2  ;;  %s7467_s8 = sshll.u32 %s8804_s5, 4  ;;  %s7468_s8 = int_to_ptr.vmem [resolvable:$true] %s7467_s8 }
 0x3df   :  { %s8780_s9 = scalar_lea.vmem %s7468_s8, 256  ;;  %p8785_p1 = scmp.lt.s32.totalorder %s7468_s8, %s7468_s8 }
 0x3e0   :  { %p8781_p0 = scmp.ne.s32.totalorder %s7468_s8, %s8780_s9  ;;  %p8786_p2 = scmp.lt.s32.totalorder %s8780_s9, %s8780_s9 }
 0x3e1   :  { %v5250_v7 = vpop.f32.mrf.mxu0 }
 0x3e2   :  { %8644 = vmatmul.mubr.msk.f32.vlgmr.msra.gmra.mxu0 %vm3641_vm2, %v5250_v7  ;;  %p8787_p3 = por %p8786_p2, %p8785_p1 }
 0x3e3   :  { %v8565_v1 = vpop.f32.mrf.mxu0  ;;  %8652 = vmatpush3.msk.msra.mxu0 %vm6222_vm4, %v6207_v9  ;;  %8653 = vmatprep.mubr.msk.f32.mxu0 %vm8803_vm1, %v8802_v2 }
 0x3e4   :  { %8661 = vmatprep.subr.mxu0 %v8802_v2  ;;  %p8788_p4 = pnand %p8787_p3, %p8781_p0 }
 0x3e5   :  { %v5323_v18 = vpop.f32.mrf.mxu1 }
 0x3e6   :  { %8649 = vmatmul.mubr.msk.f32.vlgmr.msra.gmra.mxu1 %vm3641_vm2, %v5323_v18 }
 0x3e7   :  { %v8570_v37 = vpop.f32.mrf.mxu1  ;;  %8657 = vmatpush3.msk.msra.mxu1 %vm6222_vm4, %v6208_v4  ;;  %8658 = vmatprep.mubr.msk.f32.mxu1 %vm8803_vm1, %v8802_v2 }
 0x3e8   :  { %8666 = vmatprep.subr.mxu1 %v8802_v2 }
 0x3eb   :  { %v5469_v50 = vpop.f32.mrf.mxu1 }
 0x3ec   :  { %v5396_v30 = vpop.f32.mrf.mxu0  ;;  %8659 = vmatmul.mubr.msk.f32.vlgmr.msra.gmra.mxu1 %vm3641_vm2, %v5469_v50 }
 0x3ed   :  { %8654 = vmatmul.mubr.msk.f32.vlgmr.msra.gmra.mxu0 %vm3641_vm2, %v5396_v30  ;;  %v8580_v14 = vpop.f32.mrf.mxu1  ;;  %8667 = vmatpush3.msk.msra.mxu1 %vm6222_vm4, %v6210_v5 }
 0x3ee   :  { %v8575_v15 = vpop.f32.mrf.mxu0  ;;  %8662 = vmatpush3.msk.msra.mxu0 %vm6222_vm4, %v6209_v29  ;;  %8663 = vmatprep.mubr.msk.f32.mxu0 %vm8803_vm1, %v8802_v2 }
 0x3ef   :  { %8668 = vmatprep.mubr.msk.f32.mxu1 %vm8803_vm1, %v8802_v2  ;;  %8671 = vmatprep.subr.mxu0 %v8802_v2 }
 0x3f0   :  { %8676 = vmatprep.subr.mxu1 %v8802_v2 }
 0x3f5   :  { %v5615_v25 = vpop.f32.mrf.mxu1 }
 0x3f6   :  { %v5542_v45 = vpop.f32.mrf.mxu0  ;;  %8669 = vmatmul.mubr.msk.f32.vlgmr.msra.gmra.mxu1 %vm3641_vm2, %v5615_v25 }
 0x3f7   :  { %8664 = vmatmul.mubr.msk.f32.vlgmr.msra.gmra.mxu0 %vm3641_vm2, %v5542_v45  ;;  %v8590_v44 = vpop.f32.mrf.mxu1  ;;  %8677 = vmatpush3.msk.msra.mxu1 %vm6222_vm4, %v6212_v40 }
 0x3f8   :  { %v8585_v55 = vpop.f32.mrf.mxu0  ;;  %8672 = vmatpush3.msk.msra.mxu0 %vm6222_vm4, %v6211_v23  ;;  %8673 = vmatprep.mubr.msk.f32.mxu0 %vm8803_vm1, %v8802_v2 }
 0x3f9   :  { %8678 = vmatprep.mubr.msk.f32.mxu1 %vm8803_vm1, %v8802_v2  ;;  %8681 = vmatprep.subr.mxu0 %v8802_v2 }
 0x3fa   :  { %8686 = vmatprep.subr.mxu1 %v8802_v2 }
 0x3ff   :  { %v5761_v26 = vpop.f32.mrf.mxu1 }
 0x400   :  { %v5688_v56 = vpop.f32.mrf.mxu0  ;;  %8679 = vmatmul.mubr.msk.f32.vlgmr.msra.gmra.mxu1 %vm3641_vm2, %v5761_v26 }
 0x401   :  { %8674 = vmatmul.mubr.msk.f32.vlgmr.msra.gmra.mxu0 %vm3641_vm2, %v5688_v56  ;;  %v8600_v28 = vpop.f32.mrf.mxu1  ;;  %8687 = vmatpush3.msk.msra.mxu1 %vm6222_vm4, %v6214_v49 }
 0x402   :  { %v8595_v57 = vpop.f32.mrf.mxu0  ;;  %8682 = vmatpush3.msk.msra.mxu0 %vm6222_vm4, %v6213_v27  ;;  %8683 = vmatprep.mubr.msk.f32.mxu0 %vm8803_vm1, %v8802_v2 }
 0x403   :  { %8688 = vmatprep.mubr.msk.f32.mxu1 %vm8803_vm1, %v8802_v2  ;;  %8691 = vmatprep.subr.mxu0 %v8802_v2 }
 0x404   :  { %8696 = vmatprep.subr.mxu1 %v8802_v2 }
 0x409   :  { %v5907_v31 = vpop.f32.mrf.mxu1 }
 0x40a   :  { %v5834_v58 = vpop.f32.mrf.mxu0  ;;  %8689 = vmatmul.mubr.msk.f32.vlgmr.msra.gmra.mxu1 %vm3641_vm2, %v5907_v31 }
 0x40b   :  { %8684 = vmatmul.mubr.msk.f32.vlgmr.msra.gmra.mxu0 %vm3641_vm2, %v5834_v58  ;;  %v8610_v63 = vpop.f32.mrf.mxu1  ;;  %8697 = vmatpush3.msk.msra.mxu1 %vm6222_vm4, %v6216_v47 }
 0x40c   :  { %v8605_v0 = vpop.f32.mrf.mxu0  ;;  %8692 = vmatpush3.msk.msra.mxu0 %vm6222_vm4, %v6215_v53  ;;  %8693 = vmatprep.mubr.msk.f32.mxu0 %vm8803_vm1, %v8802_v2 }
 0x40d   :  { %8698 = vmatprep.mubr.msk.f32.mxu1 %vm8803_vm1, %v8802_v2  ;;  %8701 = vmatprep.subr.mxu0 %v8802_v2 }
 0x40e   :  { %8706 = vmatprep.subr.mxu1 %v8802_v2 }
 0x413   :  { %v6053_v62 = vpop.f32.mrf.mxu1 }
 0x414   :  { %v5980_v17 = vpop.f32.mrf.mxu0  ;;  %8699 = vmatmul.mubr.msk.f32.vlgmr.msra.gmra.mxu1 %vm3641_vm2, %v6053_v62 }
 0x415   :  { %8694 = vmatmul.mubr.msk.f32.vlgmr.msra.gmra.mxu0 %vm3641_vm2, %v5980_v17  ;;  %v8620_v24 = vpop.f32.mrf.mxu1  ;;  %8707 = vmatpush3.msk.msra.mxu1 %vm6222_vm4, %v6218_v36 }
 0x416   :  { %v8615_v39 = vpop.f32.mrf.mxu0  ;;  %8702 = vmatpush3.msk.msra.mxu0 %vm6222_vm4, %v6217_v61  ;;  %8703 = vmatprep.mubr.msk.f32.mxu0 %vm8803_vm1, %v8802_v2 }
 0x417   :  { %8708 = vmatprep.mubr.msk.f32.mxu1 %vm8803_vm1, %v8802_v2 }
 0x41d   :  { %v6199_v38 = vpop.f32.mrf.mxu1 }
 0x41e   :  { %v6126_v20 = vpop.f32.mrf.mxu0  ;;  %8709 = vmatmul.mubr.msk.f32.vlgmr.msra.gmra.mxu1 %vm3641_vm2, %v6199_v38 }
 0x41f   :  { %8704 = vmatmul.mubr.msk.f32.vlgmr.msra.gmra.mxu0 %vm3641_vm2, %v6126_v20  ;;  %v8630_v19 = vpop.f32.mrf.mxu1 }
 0x420   :  { %v8625_v51 = vpop.f32.mrf.mxu0 }
 0x498   :  { %v6292_v34 = vpop.f32.mrf.mxu0 }
 0x49a   :  { %v8635_v35 = vpop.f32.mrf.mxu0 }
 0x49c   :  { %v6368_v60 = vpop.f32.mrf.mxu1 }
 0x49d   :  { %v7437_v43 = vadd.f32 %v6368_v60, %v6292_v34 }
 0x49e   :  { %v8640_v21 = vpop.f32.mrf.mxu1 }
 0x4a2   :  { %v6444_v3 = vpop.f32.mrf.mxu0 }
 0x4a3   :  { %v7438_v2 = vadd.f32 %v7437_v43, %v6444_v3 }
 0x4a4   :  { %v8645_v41 = vpop.f32.mrf.mxu0 }
 0x4a6   :  { %v6520_v22 = vpop.f32.mrf.mxu1 }
 0x4a7   :  { %v7439_v48 = vadd.f32 %v7438_v2, %v6520_v22 }
 0x4a8   :  { %v8650_v42 = vpop.f32.mrf.mxu1 }
 0x4ac   :  { %v6672_v11 = vpop.f32.mrf.mxu1 }
 0x4ad   :  { %v6596_v8 = vpop.f32.mrf.mxu0 }
 0x4ae   :  { %v8660_v46 = vpop.f32.mrf.mxu1  ;;  %v7440_v13 = vadd.f32 %v7439_v48, %v6596_v8 }
 0x4af   :  { %v8655_v16 = vpop.f32.mrf.mxu0 }
 0x4b0   :  { %v7441_v12 = vadd.f32 %v7440_v13, %v6672_v11 }
 0x4b6   :  { %v6824_v59 = vpop.f32.mrf.mxu1 }
 0x4b7   :  { %v6748_v6 = vpop.f32.mrf.mxu0 }
 0x4b8   :  { %v7442_v10 = vadd.f32 %v7441_v12, %v6748_v6  ;;  %v8670_v52 = vpop.f32.mrf.mxu1 }
 0x4b9   :  { %v8665_v33 = vpop.f32.mrf.mxu0 }
 0x4ba   :  { %v7443_v54 = vadd.f32 %v7442_v10, %v6824_v59 }
 0x4bc   :  { %v7450_v9 = vadd.f32 %v7606_v32, %v7443_v54 }
 0x4be   :  { %7451 = vst.msk [vmem:[#allocation2] sm:$0xff] %vm104_vm0, %v7450_v9 }
 0x4c0   :  { %v6976_v7 = vpop.f32.mrf.mxu1 }
 0x4c1   :  { %v6900_v1 = vpop.f32.mrf.mxu0 }
 0x4c2   :  { %v8680_v4 = vpop.f32.mrf.mxu1  ;;  %v7452_v30 = vadd.f32 %v6976_v7, %v6900_v1 }
 0x4c3   :  { %v8675_v18 = vpop.f32.mrf.mxu0 }
 0x4ca   :  { %v7128_v37 = vpop.f32.mrf.mxu1 }
 0x4cb   :  { %v7052_v5 = vpop.f32.mrf.mxu0 }
 0x4cc   :  { %v8690_v50 = vpop.f32.mrf.mxu1  ;;  %v7453_v14 = vadd.f32 %v7452_v30, %v7052_v5 }
 0x4cd   :  { %v8685_v29 = vpop.f32.mrf.mxu0 }
 0x4ce   :  { %v7454_v45 = vadd.f32 %v7453_v14, %v7128_v37 }
 0x4d4   :  { %v7280_v15 = vpop.f32.mrf.mxu1 }
 0x4d5   :  { %v7204_v40 = vpop.f32.mrf.mxu0 }
 0x4d6   :  { %v8700_v25 = vpop.f32.mrf.mxu1  ;;  %v7455_v44 = vadd.f32 %v7454_v45, %v7204_v40 }
 0x4d7   :  { %v8695_v23 = vpop.f32.mrf.mxu0 }
 0x4d8   :  { %v7456_v55 = vadd.f32 %v7455_v44, %v7280_v15 }
 0x4de   :  { %v7432_v49 = vpop.f32.mrf.mxu1 }
 0x4df   :  { %v7356_v26 = vpop.f32.mrf.mxu0 }
 0x4e0   :  { %v7457_v27 = vadd.f32 %v7456_v55, %v7356_v26  ;;  %v8710_v56 = vpop.f32.mrf.mxu1 }
 0x4e1   :  { %v8705_v28 = vpop.f32.mrf.mxu0 }
 0x4e2   :  { %v7458_v57 = vadd.f32 %v7457_v27, %v7432_v49 }
 0x4e4   :  { %v7459_v47 = vadd.f32 %v7606_v32, %v7458_v57 }
 0x4e6   :  { %7461 = vst.msk [vmem:[#allocation2 + $0x8] sm:$0xff] %vm104_vm0, %v7459_v47 }
 0x4e7   :  { %8791 = shalt.err (!%p8788_p4)
}
 0x4e8   :  { %s8805_s10 = smov 128   ;;  %s8806_s11 = smov 8  }
 0x4e9   :  { %7473 = dma.vmem_to_hbm [thread:$0]  %s7468_s8, 256, %s10418_s6, [#allocation3], %s8805_s10, %s8805_s10, %s8806_s11  }
 0x4ea   :  { %8800 = dma.done.wait [#allocation3], 256  }
 0x4eb   :  { %8801 = vsyncadd [#allocation3], 4294967040 }
 0x4ec   :  { %7477 = vsyncpa [#allocation3], 1 }

</bundles_post_ra>
